<compile_context>
chip_gen: v6e
topology: v6e:2x2x1
jax: 0.10.0
libtpu: 0.0.40
codegen_flags: <defaults>
</compile_context>

<pallas_src>
import functools

import numpy as np
import jax
import jax.numpy as jnp
from jax.experimental import pallas as pl
from jax.experimental.pallas import tpu as pltpu


# ----------------------------------------------------------------------------
# Fused kernel: all encoder layers + decoder linear, single invocation (no grid).
# x_ref      : (N, D)   flat tokens, token t = s*B + b
# mask_ref   : (N, N)   additive attention mask (0 keep / -inf drop): causal & same-batch
# wqkvT_ref  : (L, D, 3D)   pre-transposed packed in_proj weight
# woT_ref    : (L, D, D)
# w1T_ref    : (L, D, F)
# w2T_ref    : (L, F, D)
# vecs_ref   : (L, 8, V)    rows: [b_qkv, b_o, b_1, b_2, ln1_g, ln1_b, ln2_g, ln2_b] (padded)
# wdecT_ref  : (D, O)
# bdec_ref   : (1, O)
# out_ref    : (N, O)
# ----------------------------------------------------------------------------
def transformer_kernel(x_ref, mask_ref, wqkvT_ref, woT_ref, w1T_ref, w2T_ref,
                       vecs_ref, wdecT_ref, bdec_ref, out_ref, *, num_heads):
    N, D = x_ref.shape
    F = w1T_ref.shape[-1]
    L = wqkvT_ref.shape[0]
    H = num_heads
    hd = D // H
    scale = float(hd) ** -0.5

    x = x_ref[...].astype(jnp.float32)          # (N, D)
    mask = mask_ref[...]                        # (N, N) additive

    for l in range(L):                          # static unroll over layers
        wqkvT = wqkvT_ref[l]                    # (D, 3D)   already transposed
        woT = woT_ref[l]                        # (D, D)
        w1T = w1T_ref[l]                        # (D, F)
        w2T = w2T_ref[l]                        # (F, D)
        vec = vecs_ref[l]                       # (8, V) packed small params
        b_qkv = vec[0:1, :3 * D]
        b_o = vec[1:2, :D]
        b_1 = vec[2:3, :F]
        b_2 = vec[3:4, :D]
        g1 = vec[4:5, :D]
        bt1 = vec[5:6, :D]
        g2 = vec[6:7, :D]
        bt2 = vec[7:8, :D]

        # ---- self-attention (packed QKV projection, one MXU push) ----
        qkv = jnp.dot(x, wqkvT, preferred_element_type=jnp.float32) + b_qkv   # (N, 3D)
        q = qkv[:, 0 * D:1 * D] * scale
        k = qkv[:, 1 * D:2 * D]
        v = qkv[:, 2 * D:3 * D]

        head_outs = []
        for h in range(H):                      # static unroll over heads
            sl = slice(h * hd, (h + 1) * hd)
            # full-slab scores; cross-batch pairs are killed by the additive mask
            s = jnp.einsum('qd,kd->qk', q[:, sl], k[:, sl],
                           preferred_element_type=jnp.float32) + mask          # (N, N)
            m = jnp.max(s, axis=-1, keepdims=True)
            p = jnp.exp(s - m)
            p = p * pl.reciprocal(jnp.sum(p, axis=-1, keepdims=True), approx=True)
            head_outs.append(jnp.dot(p, v[:, sl],
                                     preferred_element_type=jnp.float32))      # (N, hd)
        attn = jnp.concatenate(head_outs, axis=-1)                             # (N, D)
        attn = jnp.dot(attn, woT, preferred_element_type=jnp.float32) + b_o

        # ---- residual + LayerNorm1 ----
        x1 = x + attn
        mu1 = jnp.mean(x1, axis=-1, keepdims=True)
        var1 = jnp.mean(jnp.square(x1 - mu1), axis=-1, keepdims=True)
        x1 = (x1 - mu1) * jax.lax.rsqrt(var1 + 1e-5) * g1 + bt1

        # ---- FFN: linear1 -> ReLU -> linear2 ----
        h1 = jnp.maximum(jnp.dot(x1, w1T, preferred_element_type=jnp.float32) + b_1, 0.0)
        h2 = jnp.dot(h1, w2T, preferred_element_type=jnp.float32) + b_2

        # ---- residual + LayerNorm2 ----
        x2 = x1 + h2
        mu2 = jnp.mean(x2, axis=-1, keepdims=True)
        var2 = jnp.mean(jnp.square(x2 - mu2), axis=-1, keepdims=True)
        x = (x2 - mu2) * jax.lax.rsqrt(var2 + 1e-5) * g2 + bt2

    # ---- decoder linear ----
    y = jnp.dot(x, wdecT_ref[...], preferred_element_type=jnp.float32) + bdec_ref[...]
    out_ref[...] = y.astype(out_ref.dtype)      # lane-dense (N, O) slab


# ----------------------------------------------------------------------------
# Host-side parameter packing (pre-transpose + stack + pack small vectors)
# ----------------------------------------------------------------------------
def build_attention_mask(S, B):
    """(N, N) additive mask for flat tokens t = s*B + b: causal within a batch element,
    -inf across batch elements (same effect as per-batch causal attention)."""
    t = np.arange(S * B)
    s_idx, b_idx = t // B, t % B
    keep = (s_idx[:, None] >= s_idx[None, :]) & (b_idx[:, None] == b_idx[None, :])
    return jnp.asarray(np.where(keep, 0.0, -np.inf).astype(np.float32))


def pack_params(layers, dec, S, B):
    D = layers[0]["w_o"].shape[0]
    F = layers[0]["w1"].shape[0]
    V = max(3 * D, F, D)

    def row(vec1d):
        return jnp.pad(vec1d, (0, V - vec1d.shape[0]))[None, :]

    wqkvT, woT, w1T, w2T, vecs = [], [], [], [], []
    for p in layers:
        wqkvT.append(p["w_qkv"].T)              # (D, 3D)
        woT.append(p["w_o"].T)                  # (D, D)
        w1T.append(p["w1"].T)                   # (D, F)
        w2T.append(p["w2"].T)                   # (F, D)
        vecs.append(jnp.concatenate([
            row(p["b_qkv"]), row(p["b_o"]), row(p["b1"]), row(p["b2"]),
            row(p["g1"]), row(p["beta1"]), row(p["g2"]), row(p["beta2"])], axis=0))
    return {
        "mask": build_attention_mask(S, B),
        "wqkvT": jnp.stack(wqkvT), "woT": jnp.stack(woT),
        "w1T": jnp.stack(w1T), "w2T": jnp.stack(w2T),
        "vecs": jnp.stack(vecs),
        "wdecT": dec["w"].T, "bdec": dec["b"][None, :],
    }


def my_transformer_forward(x_sbd, kp, *, num_heads):
    """x_sbd: (S, B, D) as in PyTorch (batch_first=False). Returns (S, B, O)."""
    S, B, D = x_sbd.shape
    O = kp["wdecT"].shape[1]
    N = S * B
    x2d = x_sbd.reshape(N, D)                   # free row-major reshape (no transpose/copy)

    kern = functools.partial(transformer_kernel, num_heads=num_heads)
    y = pl.pallas_call(
        kern,
        out_shape=jax.ShapeDtypeStruct((N, O), jnp.float32),
        in_specs=[pl.BlockSpec(memory_space=pltpu.MemorySpace.VMEM)] * 9,
        out_specs=pl.BlockSpec(memory_space=pltpu.MemorySpace.VMEM),
        compiler_params=pltpu.CompilerParams(vmem_limit_bytes=32 * 1024 * 1024),
    )(x2d, kp["mask"], kp["wqkvT"], kp["woT"], kp["w1T"], kp["w2T"],
      kp["vecs"], kp["wdecT"], kp["bdec"])
    return y.reshape(S, B, O)                   # free reshape back to (S, B, O)


# ----------------------------------------------------------------------------
# Parameter init (PyTorch-style layout) + pure-JAX reference for correctness.
# ----------------------------------------------------------------------------
def init_params(key, input_dim, output_dim, hidden_dim, num_layers):
    D, F, O = input_dim, hidden_dim, output_dim
    layers = []
    for _ in range(num_layers):
        keys = jax.random.split(key, 8)
        key = keys[0]
        layers.append({
            "w_qkv": 0.05 * jax.random.normal(keys[1], (3 * D, D), jnp.float32),
            "b_qkv": 0.01 * jax.random.normal(keys[2], (3 * D,), jnp.float32),
            "w_o": 0.05 * jax.random.normal(keys[3], (D, D), jnp.float32),
            "b_o": 0.01 * jax.random.normal(keys[4], (D,), jnp.float32),
            "w1": 0.05 * jax.random.normal(keys[5], (F, D), jnp.float32),
            "b1": 0.01 * jax.random.normal(keys[6], (F,), jnp.float32),
            "w2": 0.05 * jax.random.normal(keys[7], (D, F), jnp.float32),
            "b2": jnp.zeros((D,), jnp.float32),
            "g1": jnp.ones((D,), jnp.float32), "beta1": jnp.zeros((D,), jnp.float32),
            "g2": jnp.ones((D,), jnp.float32), "beta2": jnp.zeros((D,), jnp.float32),
        })
    kd1, kd2 = jax.random.split(key)
    dec = {"w": 0.05 * jax.random.normal(kd1, (O, D), jnp.float32),
           "b": 0.01 * jax.random.normal(kd2, (O,), jnp.float32)}
    return layers, dec


def reference_forward(x_sbd, layers, dec, num_heads):
    S, B, D = x_sbd.shape
    H = num_heads
    hd = D // H
    causal = jnp.arange(S)[:, None] >= jnp.arange(S)[None, :]
    x = jnp.transpose(x_sbd, (1, 0, 2))          # (B, S, D)
    for p in layers:
        qkv = x @ p["w_qkv"].T + p["b_qkv"]
        q, k, v = qkv[..., :D], qkv[..., D:2 * D], qkv[..., 2 * D:]
        qh = q.reshape(B, S, H, hd).transpose(0, 2, 1, 3)
        kh = k.reshape(B, S, H, hd).transpose(0, 2, 1, 3)
        vh = v.reshape(B, S, H, hd).transpose(0, 2, 1, 3)
        s = jnp.einsum("bhqd,bhkd->bhqk", qh, kh) / jnp.sqrt(jnp.float32(hd))
        s = jnp.where(causal[None, None], s, -jnp.inf)
        pm = jax.nn.softmax(s, axis=-1)
        o = jnp.einsum("bhqk,bhkd->bhqd", pm, vh).transpose(0, 2, 1, 3).reshape(B, S, D)
        attn = o @ p["w_o"].T + p["b_o"]
        x1 = x + attn
        mu = x1.mean(-1, keepdims=True)
        var = ((x1 - mu) ** 2).mean(-1, keepdims=True)
        x1 = (x1 - mu) / jnp.sqrt(var + 1e-5) * p["g1"] + p["beta1"]
        hmid = jnp.maximum(x1 @ p["w1"].T + p["b1"], 0.0) @ p["w2"].T + p["b2"]
        x2 = x1 + hmid
        mu2 = x2.mean(-1, keepdims=True)
        var2 = ((x2 - mu2) ** 2).mean(-1, keepdims=True)
        x = (x2 - mu2) / jnp.sqrt(var2 + 1e-5) * p["g2"] + p["beta2"]
    x = jnp.transpose(x, (1, 0, 2))              # back to (S, B, D)
    return x @ dec["w"].T + dec["b"]


if __name__ == "__main__":
    # Module hyper-params (small, consistent with the PyTorch module)
    input_dim, output_dim, hidden_dim = 32, 8, 64
    num_layers, num_heads = 2, 4
    seq, batch = 8, 2

    key = jax.random.PRNGKey(0)
    kx, kp_key = jax.random.split(key)
    x = jax.random.normal(kx, (seq, batch, input_dim), jnp.float32)   # (S, B, D)

    layers, dec = init_params(kp_key, input_dim, output_dim, hidden_dim, num_layers)
    kparams = pack_params(layers, dec, seq, batch)

    fwd = jax.jit(functools.partial(my_transformer_forward, num_heads=num_heads))
    out = jax.block_until_ready(fwd(x, kparams))

    ref = reference_forward(x, layers, dec, num_heads)
    assert out.shape == (seq, batch, output_dim)
    # tolerance covers MXU f32 passes and the approximate (EUP) softmax reciprocal
    assert jnp.allclose(out, ref, atol=2e-3, rtol=2e-3), "mismatch vs reference"

    print("KERNEL_OK")
</pallas_src>

<mosaic_0001>
module attributes {stable_mosaic.version = 11 : i64} {
  func.func @transformer_kernel(%arg0: memref<16x32xf32, #tpu.memory_space<vmem>>, %arg1: memref<16x16xf32, #tpu.memory_space<vmem>>, %arg2: memref<2x32x96xf32, #tpu.memory_space<vmem>>, %arg3: memref<2x32x32xf32, #tpu.memory_space<vmem>>, %arg4: memref<2x32x64xf32, #tpu.memory_space<vmem>>, %arg5: memref<2x64x32xf32, #tpu.memory_space<vmem>>, %arg6: memref<2x8x96xf32, #tpu.memory_space<vmem>>, %arg7: memref<32x8xf32, #tpu.memory_space<vmem>>, %arg8: memref<1x8xf32, #tpu.memory_space<vmem>>, %arg9: memref<16x8xf32, #tpu.memory_space<vmem>>) attributes {dimension_semantics = [], scalar_prefetch = 0 : i64, scratch_operands = 0 : i64, tpu.core_type = #tpu.core_type<tc>} {
    %c0 = arith.constant 0 : index
    %c0_0 = arith.constant 0 : index
    %0 = vector.load %arg0[%c0, %c0_0] : memref<16x32xf32, #tpu.memory_space<vmem>>, vector<16x32xf32>
    %c0_1 = arith.constant 0 : index
    %c0_2 = arith.constant 0 : index
    %1 = vector.load %arg1[%c0_1, %c0_2] : memref<16x16xf32, #tpu.memory_space<vmem>>, vector<16x16xf32>
    %c0_3 = arith.constant 0 : index
    %c0_4 = arith.constant 0 : index
    %c0_5 = arith.constant 0 : index
    %2 = vector.load %arg2[%c0_3, %c0_4, %c0_5] : memref<2x32x96xf32, #tpu.memory_space<vmem>>, vector<1x32x96xf32>
    %3 = vector.shape_cast %2 : vector<1x32x96xf32> to vector<32x96xf32>
    %c0_6 = arith.constant 0 : index
    %c0_7 = arith.constant 0 : index
    %c0_8 = arith.constant 0 : index
    %4 = vector.load %arg3[%c0_6, %c0_7, %c0_8] : memref<2x32x32xf32, #tpu.memory_space<vmem>>, vector<1x32x32xf32>
    %5 = vector.shape_cast %4 : vector<1x32x32xf32> to vector<32x32xf32>
    %c0_9 = arith.constant 0 : index
    %c0_10 = arith.constant 0 : index
    %c0_11 = arith.constant 0 : index
    %6 = vector.load %arg4[%c0_9, %c0_10, %c0_11] : memref<2x32x64xf32, #tpu.memory_space<vmem>>, vector<1x32x64xf32>
    %7 = vector.shape_cast %6 : vector<1x32x64xf32> to vector<32x64xf32>
    %c0_12 = arith.constant 0 : index
    %c0_13 = arith.constant 0 : index
    %c0_14 = arith.constant 0 : index
    %8 = vector.load %arg5[%c0_12, %c0_13, %c0_14] : memref<2x64x32xf32, #tpu.memory_space<vmem>>, vector<1x64x32xf32>
    %9 = vector.shape_cast %8 : vector<1x64x32xf32> to vector<64x32xf32>
    %c0_15 = arith.constant 0 : index
    %c0_16 = arith.constant 0 : index
    %c0_17 = arith.constant 0 : index
    %10 = vector.load %arg6[%c0_15, %c0_16, %c0_17] : memref<2x8x96xf32, #tpu.memory_space<vmem>>, vector<1x8x96xf32>
    %11 = vector.shape_cast %10 : vector<1x8x96xf32> to vector<8x96xf32>
    %12 = vector.extract_strided_slice %11 {offsets = [0, 0], sizes = [1, 96], strides = [1, 1]} : vector<8x96xf32> to vector<1x96xf32>
    %13 = vector.extract_strided_slice %11 {offsets = [1, 0], sizes = [1, 32], strides = [1, 1]} : vector<8x96xf32> to vector<1x32xf32>
    %14 = vector.extract_strided_slice %11 {offsets = [2, 0], sizes = [1, 64], strides = [1, 1]} : vector<8x96xf32> to vector<1x64xf32>
    %15 = vector.extract_strided_slice %11 {offsets = [3, 0], sizes = [1, 32], strides = [1, 1]} : vector<8x96xf32> to vector<1x32xf32>
    %16 = vector.extract_strided_slice %11 {offsets = [4, 0], sizes = [1, 32], strides = [1, 1]} : vector<8x96xf32> to vector<1x32xf32>
    %17 = vector.extract_strided_slice %11 {offsets = [5, 0], sizes = [1, 32], strides = [1, 1]} : vector<8x96xf32> to vector<1x32xf32>
    %18 = vector.extract_strided_slice %11 {offsets = [6, 0], sizes = [1, 32], strides = [1, 1]} : vector<8x96xf32> to vector<1x32xf32>
    %19 = vector.extract_strided_slice %11 {offsets = [7, 0], sizes = [1, 32], strides = [1, 1]} : vector<8x96xf32> to vector<1x32xf32>
    %cst = arith.constant dense<0.000000e+00> : vector<16x96xf32>
    %20 = tpu.matmul %0, %3, %cst {dimension_numbers = #tpu.dot_dimension_numbers<[1], [0], [0], [1], [0, 0, 1, 1], [], []>} : vector<16x32xf32>, vector<32x96xf32>, vector<16x96xf32> -> vector<16x96xf32>
    %21 = vector.broadcast %12 : vector<1x96xf32> to vector<16x96xf32>
    %22 = arith.addf %20, %21 : vector<16x96xf32>
    %23 = vector.extract_strided_slice %22 {offsets = [0, 0], sizes = [16, 32], strides = [1, 1]} : vector<16x96xf32> to vector<16x32xf32>
    %cst_18 = arith.constant 0.353553385 : f32
    %24 = vector.broadcast %cst_18 : f32 to vector<16x32xf32>
    %25 = arith.mulf %23, %24 : vector<16x32xf32>
    %26 = vector.extract_strided_slice %22 {offsets = [0, 32], sizes = [16, 32], strides = [1, 1]} : vector<16x96xf32> to vector<16x32xf32>
    %27 = vector.extract_strided_slice %22 {offsets = [0, 64], sizes = [16, 32], strides = [1, 1]} : vector<16x96xf32> to vector<16x32xf32>
    %28 = vector.extract_strided_slice %25 {offsets = [0, 0], sizes = [16, 8], strides = [1, 1]} : vector<16x32xf32> to vector<16x8xf32>
    %29 = vector.extract_strided_slice %26 {offsets = [0, 0], sizes = [16, 8], strides = [1, 1]} : vector<16x32xf32> to vector<16x8xf32>
    "tpu.trace_start"() <{level = 10 : i32, message = "qd,kd->qk"}> : () -> ()
    %cst_19 = arith.constant dense<0.000000e+00> : vector<16x16xf32>
    %30 = tpu.matmul %28, %29, %cst_19 {dimension_numbers = #tpu.dot_dimension_numbers<[1], [1], [0], [0], [0, 0, 1, 0], [], []>} : vector<16x8xf32>, vector<16x8xf32>, vector<16x16xf32> -> vector<16x16xf32>
    "tpu.trace_stop"() : () -> ()
    %31 = arith.addf %30, %1 : vector<16x16xf32>
    %cst_20 = arith.constant dense<0xFF800000> : vector<16xf32>
    %32 = vector.multi_reduction <maximumf>, %31, %cst_20 [1] : vector<16x16xf32> to vector<16xf32>
    %33 = vector.shape_cast %32 : vector<16xf32> to vector<16x1xf32>
    %34 = vector.broadcast %33 : vector<16x1xf32> to vector<16x16xf32>
    %35 = arith.subf %31, %34 : vector<16x16xf32>
    %36 = math.exp %35 : vector<16x16xf32>
    %cst_21 = arith.constant dense<0.000000e+00> : vector<16xf32>
    %37 = vector.multi_reduction <add>, %36, %cst_21 [1] : vector<16x16xf32> to vector<16xf32>
    %38 = vector.shape_cast %37 : vector<16xf32> to vector<16x1xf32>
    %39 = tpu.reciprocal %38 {approx = true} : vector<16x1xf32> -> vector<16x1xf32>
    %40 = vector.broadcast %39 : vector<16x1xf32> to vector<16x16xf32>
    %41 = arith.mulf %36, %40 : vector<16x16xf32>
    %42 = vector.extract_strided_slice %27 {offsets = [0, 0], sizes = [16, 8], strides = [1, 1]} : vector<16x32xf32> to vector<16x8xf32>
    %cst_22 = arith.constant dense<0.000000e+00> : vector<16x8xf32>
    %43 = tpu.matmul %41, %42, %cst_22 {dimension_numbers = #tpu.dot_dimension_numbers<[1], [0], [0], [1], [0, 0, 1, 1], [], []>} : vector<16x16xf32>, vector<16x8xf32>, vector<16x8xf32> -> vector<16x8xf32>
    %44 = vector.extract_strided_slice %25 {offsets = [0, 8], sizes = [16, 8], strides = [1, 1]} : vector<16x32xf32> to vector<16x8xf32>
    %45 = vector.extract_strided_slice %26 {offsets = [0, 8], sizes = [16, 8], strides = [1, 1]} : vector<16x32xf32> to vector<16x8xf32>
    "tpu.trace_start"() <{level = 10 : i32, message = "qd,kd->qk"}> : () -> ()
    %cst_23 = arith.constant dense<0.000000e+00> : vector<16x16xf32>
    %46 = tpu.matmul %44, %45, %cst_23 {dimension_numbers = #tpu.dot_dimension_numbers<[1], [1], [0], [0], [0, 0, 1, 0], [], []>} : vector<16x8xf32>, vector<16x8xf32>, vector<16x16xf32> -> vector<16x16xf32>
    "tpu.trace_stop"() : () -> ()
    %47 = arith.addf %46, %1 : vector<16x16xf32>
    %cst_24 = arith.constant dense<0xFF800000> : vector<16xf32>
    %48 = vector.multi_reduction <maximumf>, %47, %cst_24 [1] : vector<16x16xf32> to vector<16xf32>
    %49 = vector.shape_cast %48 : vector<16xf32> to vector<16x1xf32>
    %50 = vector.broadcast %49 : vector<16x1xf32> to vector<16x16xf32>
    %51 = arith.subf %47, %50 : vector<16x16xf32>
    %52 = math.exp %51 : vector<16x16xf32>
    %cst_25 = arith.constant dense<0.000000e+00> : vector<16xf32>
    %53 = vector.multi_reduction <add>, %52, %cst_25 [1] : vector<16x16xf32> to vector<16xf32>
    %54 = vector.shape_cast %53 : vector<16xf32> to vector<16x1xf32>
    %55 = tpu.reciprocal %54 {approx = true} : vector<16x1xf32> -> vector<16x1xf32>
    %56 = vector.broadcast %55 : vector<16x1xf32> to vector<16x16xf32>
    %57 = arith.mulf %52, %56 : vector<16x16xf32>
    %58 = vector.extract_strided_slice %27 {offsets = [0, 8], sizes = [16, 8], strides = [1, 1]} : vector<16x32xf32> to vector<16x8xf32>
    %cst_26 = arith.constant dense<0.000000e+00> : vector<16x8xf32>
    %59 = tpu.matmul %57, %58, %cst_26 {dimension_numbers = #tpu.dot_dimension_numbers<[1], [0], [0], [1], [0, 0, 1, 1], [], []>} : vector<16x16xf32>, vector<16x8xf32>, vector<16x8xf32> -> vector<16x8xf32>
    %60 = vector.extract_strided_slice %25 {offsets = [0, 16], sizes = [16, 8], strides = [1, 1]} : vector<16x32xf32> to vector<16x8xf32>
    %61 = vector.extract_strided_slice %26 {offsets = [0, 16], sizes = [16, 8], strides = [1, 1]} : vector<16x32xf32> to vector<16x8xf32>
    "tpu.trace_start"() <{level = 10 : i32, message = "qd,kd->qk"}> : () -> ()
    %cst_27 = arith.constant dense<0.000000e+00> : vector<16x16xf32>
    %62 = tpu.matmul %60, %61, %cst_27 {dimension_numbers = #tpu.dot_dimension_numbers<[1], [1], [0], [0], [0, 0, 1, 0], [], []>} : vector<16x8xf32>, vector<16x8xf32>, vector<16x16xf32> -> vector<16x16xf32>
    "tpu.trace_stop"() : () -> ()
    %63 = arith.addf %62, %1 : vector<16x16xf32>
    %cst_28 = arith.constant dense<0xFF800000> : vector<16xf32>
    %64 = vector.multi_reduction <maximumf>, %63, %cst_28 [1] : vector<16x16xf32> to vector<16xf32>
    %65 = vector.shape_cast %64 : vector<16xf32> to vector<16x1xf32>
    %66 = vector.broadcast %65 : vector<16x1xf32> to vector<16x16xf32>
    %67 = arith.subf %63, %66 : vector<16x16xf32>
    %68 = math.exp %67 : vector<16x16xf32>
    %cst_29 = arith.constant dense<0.000000e+00> : vector<16xf32>
    %69 = vector.multi_reduction <add>, %68, %cst_29 [1] : vector<16x16xf32> to vector<16xf32>
    %70 = vector.shape_cast %69 : vector<16xf32> to vector<16x1xf32>
    %71 = tpu.reciprocal %70 {approx = true} : vector<16x1xf32> -> vector<16x1xf32>
    %72 = vector.broadcast %71 : vector<16x1xf32> to vector<16x16xf32>
    %73 = arith.mulf %68, %72 : vector<16x16xf32>
    %74 = vector.extract_strided_slice %27 {offsets = [0, 16], sizes = [16, 8], strides = [1, 1]} : vector<16x32xf32> to vector<16x8xf32>
    %cst_30 = arith.constant dense<0.000000e+00> : vector<16x8xf32>
    %75 = tpu.matmul %73, %74, %cst_30 {dimension_numbers = #tpu.dot_dimension_numbers<[1], [0], [0], [1], [0, 0, 1, 1], [], []>} : vector<16x16xf32>, vector<16x8xf32>, vector<16x8xf32> -> vector<16x8xf32>
    %76 = vector.extract_strided_slice %25 {offsets = [0, 24], sizes = [16, 8], strides = [1, 1]} : vector<16x32xf32> to vector<16x8xf32>
    %77 = vector.extract_strided_slice %26 {offsets = [0, 24], sizes = [16, 8], strides = [1, 1]} : vector<16x32xf32> to vector<16x8xf32>
    "tpu.trace_start"() <{level = 10 : i32, message = "qd,kd->qk"}> : () -> ()
    %cst_31 = arith.constant dense<0.000000e+00> : vector<16x16xf32>
    %78 = tpu.matmul %76, %77, %cst_31 {dimension_numbers = #tpu.dot_dimension_numbers<[1], [1], [0], [0], [0, 0, 1, 0], [], []>} : vector<16x8xf32>, vector<16x8xf32>, vector<16x16xf32> -> vector<16x16xf32>
    "tpu.trace_stop"() : () -> ()
    %79 = arith.addf %78, %1 : vector<16x16xf32>
    %cst_32 = arith.constant dense<0xFF800000> : vector<16xf32>
    %80 = vector.multi_reduction <maximumf>, %79, %cst_32 [1] : vector<16x16xf32> to vector<16xf32>
    %81 = vector.shape_cast %80 : vector<16xf32> to vector<16x1xf32>
    %82 = vector.broadcast %81 : vector<16x1xf32> to vector<16x16xf32>
    %83 = arith.subf %79, %82 : vector<16x16xf32>
    %84 = math.exp %83 : vector<16x16xf32>
    %cst_33 = arith.constant dense<0.000000e+00> : vector<16xf32>
    %85 = vector.multi_reduction <add>, %84, %cst_33 [1] : vector<16x16xf32> to vector<16xf32>
    %86 = vector.shape_cast %85 : vector<16xf32> to vector<16x1xf32>
    %87 = tpu.reciprocal %86 {approx = true} : vector<16x1xf32> -> vector<16x1xf32>
    %88 = vector.broadcast %87 : vector<16x1xf32> to vector<16x16xf32>
    %89 = arith.mulf %84, %88 : vector<16x16xf32>
    %90 = vector.extract_strided_slice %27 {offsets = [0, 24], sizes = [16, 8], strides = [1, 1]} : vector<16x32xf32> to vector<16x8xf32>
    %cst_34 = arith.constant dense<0.000000e+00> : vector<16x8xf32>
    %91 = tpu.matmul %89, %90, %cst_34 {dimension_numbers = #tpu.dot_dimension_numbers<[1], [0], [0], [1], [0, 0, 1, 1], [], []>} : vector<16x16xf32>, vector<16x8xf32>, vector<16x8xf32> -> vector<16x8xf32>
    %92 = tpu.concatenate %43, %59, %75, %91 in 1 : vector<16x8xf32>, vector<16x8xf32>, vector<16x8xf32>, vector<16x8xf32> -> vector<16x32xf32>
    %cst_35 = arith.constant dense<0.000000e+00> : vector<16x32xf32>
    %93 = tpu.matmul %92, %5, %cst_35 {dimension_numbers = #tpu.dot_dimension_numbers<[1], [0], [0], [1], [0, 0, 1, 1], [], []>} : vector<16x32xf32>, vector<32x32xf32>, vector<16x32xf32> -> vector<16x32xf32>
    %94 = vector.broadcast %13 : vector<1x32xf32> to vector<16x32xf32>
    %95 = arith.addf %93, %94 : vector<16x32xf32>
    %96 = arith.addf %0, %95 : vector<16x32xf32>
    %cst_36 = arith.constant dense<0.000000e+00> : vector<16xf32>
    %97 = vector.multi_reduction <add>, %96, %cst_36 [1] : vector<16x32xf32> to vector<16xf32>
    %98 = vector.shape_cast %97 : vector<16xf32> to vector<16x1xf32>
    %cst_37 = arith.constant 3.200000e+01 : f32
    %99 = vector.broadcast %cst_37 : f32 to vector<16x1xf32>
    %100 = arith.divf %98, %99 : vector<16x1xf32>
    %101 = vector.broadcast %100 : vector<16x1xf32> to vector<16x32xf32>
    %102 = arith.subf %96, %101 : vector<16x32xf32>
    %103 = arith.mulf %102, %102 : vector<16x32xf32>
    %cst_38 = arith.constant dense<0.000000e+00> : vector<16xf32>
    %104 = vector.multi_reduction <add>, %103, %cst_38 [1] : vector<16x32xf32> to vector<16xf32>
    %105 = vector.shape_cast %104 : vector<16xf32> to vector<16x1xf32>
    %cst_39 = arith.constant 3.200000e+01 : f32
    %106 = vector.broadcast %cst_39 : f32 to vector<16x1xf32>
    %107 = arith.divf %105, %106 : vector<16x1xf32>
    %108 = vector.broadcast %100 : vector<16x1xf32> to vector<16x32xf32>
    %109 = arith.subf %96, %108 : vector<16x32xf32>
    %cst_40 = arith.constant 9.99999974E-6 : f32
    %110 = vector.broadcast %cst_40 : f32 to vector<16x1xf32>
    %111 = arith.addf %107, %110 : vector<16x1xf32>
    %112 = math.rsqrt %111 : vector<16x1xf32>
    %113 = vector.broadcast %112 : vector<16x1xf32> to vector<16x32xf32>
    %114 = arith.mulf %109, %113 : vector<16x32xf32>
    %115 = vector.broadcast %16 : vector<1x32xf32> to vector<16x32xf32>
    %116 = arith.mulf %114, %115 : vector<16x32xf32>
    %117 = vector.broadcast %17 : vector<1x32xf32> to vector<16x32xf32>
    %118 = arith.addf %116, %117 : vector<16x32xf32>
    %cst_41 = arith.constant dense<0.000000e+00> : vector<16x64xf32>
    %119 = tpu.matmul %118, %7, %cst_41 {dimension_numbers = #tpu.dot_dimension_numbers<[1], [0], [0], [1], [0, 0, 1, 1], [], []>} : vector<16x32xf32>, vector<32x64xf32>, vector<16x64xf32> -> vector<16x64xf32>
    %120 = vector.broadcast %14 : vector<1x64xf32> to vector<16x64xf32>
    %121 = arith.addf %119, %120 : vector<16x64xf32>
    %cst_42 = arith.constant 0.000000e+00 : f32
    %122 = vector.broadcast %cst_42 : f32 to vector<16x64xf32>
    %123 = arith.maximumf %121, %122 : vector<16x64xf32>
    %cst_43 = arith.constant dense<0.000000e+00> : vector<16x32xf32>
    %124 = tpu.matmul %123, %9, %cst_43 {dimension_numbers = #tpu.dot_dimension_numbers<[1], [0], [0], [1], [0, 0, 1, 1], [], []>} : vector<16x64xf32>, vector<64x32xf32>, vector<16x32xf32> -> vector<16x32xf32>
    %125 = vector.broadcast %15 : vector<1x32xf32> to vector<16x32xf32>
    %126 = arith.addf %124, %125 : vector<16x32xf32>
    %127 = arith.addf %118, %126 : vector<16x32xf32>
    %cst_44 = arith.constant dense<0.000000e+00> : vector<16xf32>
    %128 = vector.multi_reduction <add>, %127, %cst_44 [1] : vector<16x32xf32> to vector<16xf32>
    %129 = vector.shape_cast %128 : vector<16xf32> to vector<16x1xf32>
    %cst_45 = arith.constant 3.200000e+01 : f32
    %130 = vector.broadcast %cst_45 : f32 to vector<16x1xf32>
    %131 = arith.divf %129, %130 : vector<16x1xf32>
    %132 = vector.broadcast %131 : vector<16x1xf32> to vector<16x32xf32>
    %133 = arith.subf %127, %132 : vector<16x32xf32>
    %134 = arith.mulf %133, %133 : vector<16x32xf32>
    %cst_46 = arith.constant dense<0.000000e+00> : vector<16xf32>
    %135 = vector.multi_reduction <add>, %134, %cst_46 [1] : vector<16x32xf32> to vector<16xf32>
    %136 = vector.shape_cast %135 : vector<16xf32> to vector<16x1xf32>
    %cst_47 = arith.constant 3.200000e+01 : f32
    %137 = vector.broadcast %cst_47 : f32 to vector<16x1xf32>
    %138 = arith.divf %136, %137 : vector<16x1xf32>
    %139 = vector.broadcast %131 : vector<16x1xf32> to vector<16x32xf32>
    %140 = arith.subf %127, %139 : vector<16x32xf32>
    %cst_48 = arith.constant 9.99999974E-6 : f32
    %141 = vector.broadcast %cst_48 : f32 to vector<16x1xf32>
    %142 = arith.addf %138, %141 : vector<16x1xf32>
    %143 = math.rsqrt %142 : vector<16x1xf32>
    %144 = vector.broadcast %143 : vector<16x1xf32> to vector<16x32xf32>
    %145 = arith.mulf %140, %144 : vector<16x32xf32>
    %146 = vector.broadcast %18 : vector<1x32xf32> to vector<16x32xf32>
    %147 = arith.mulf %145, %146 : vector<16x32xf32>
    %148 = vector.broadcast %19 : vector<1x32xf32> to vector<16x32xf32>
    %149 = arith.addf %147, %148 : vector<16x32xf32>
    %c1 = arith.constant 1 : index
    %c0_49 = arith.constant 0 : index
    %c0_50 = arith.constant 0 : index
    %150 = vector.load %arg2[%c1, %c0_49, %c0_50] : memref<2x32x96xf32, #tpu.memory_space<vmem>>, vector<1x32x96xf32>
    %151 = vector.shape_cast %150 : vector<1x32x96xf32> to vector<32x96xf32>
    %c1_51 = arith.constant 1 : index
    %c0_52 = arith.constant 0 : index
    %c0_53 = arith.constant 0 : index
    %152 = vector.load %arg3[%c1_51, %c0_52, %c0_53] : memref<2x32x32xf32, #tpu.memory_space<vmem>>, vector<1x32x32xf32>
    %153 = vector.shape_cast %152 : vector<1x32x32xf32> to vector<32x32xf32>
    %c1_54 = arith.constant 1 : index
    %c0_55 = arith.constant 0 : index
    %c0_56 = arith.constant 0 : index
    %154 = vector.load %arg4[%c1_54, %c0_55, %c0_56] : memref<2x32x64xf32, #tpu.memory_space<vmem>>, vector<1x32x64xf32>
    %155 = vector.shape_cast %154 : vector<1x32x64xf32> to vector<32x64xf32>
    %c1_57 = arith.constant 1 : index
    %c0_58 = arith.constant 0 : index
    %c0_59 = arith.constant 0 : index
    %156 = vector.load %arg5[%c1_57, %c0_58, %c0_59] : memref<2x64x32xf32, #tpu.memory_space<vmem>>, vector<1x64x32xf32>
    %157 = vector.shape_cast %156 : vector<1x64x32xf32> to vector<64x32xf32>
    %c1_60 = arith.constant 1 : index
    %c0_61 = arith.constant 0 : index
    %c0_62 = arith.constant 0 : index
    %158 = vector.load %arg6[%c1_60, %c0_61, %c0_62] : memref<2x8x96xf32, #tpu.memory_space<vmem>>, vector<1x8x96xf32>
    %159 = vector.shape_cast %158 : vector<1x8x96xf32> to vector<8x96xf32>
    %160 = vector.extract_strided_slice %159 {offsets = [0, 0], sizes = [1, 96], strides = [1, 1]} : vector<8x96xf32> to vector<1x96xf32>
    %161 = vector.extract_strided_slice %159 {offsets = [1, 0], sizes = [1, 32], strides = [1, 1]} : vector<8x96xf32> to vector<1x32xf32>
    %162 = vector.extract_strided_slice %159 {offsets = [2, 0], sizes = [1, 64], strides = [1, 1]} : vector<8x96xf32> to vector<1x64xf32>
    %163 = vector.extract_strided_slice %159 {offsets = [3, 0], sizes = [1, 32], strides = [1, 1]} : vector<8x96xf32> to vector<1x32xf32>
    %164 = vector.extract_strided_slice %159 {offsets = [4, 0], sizes = [1, 32], strides = [1, 1]} : vector<8x96xf32> to vector<1x32xf32>
    %165 = vector.extract_strided_slice %159 {offsets = [5, 0], sizes = [1, 32], strides = [1, 1]} : vector<8x96xf32> to vector<1x32xf32>
    %166 = vector.extract_strided_slice %159 {offsets = [6, 0], sizes = [1, 32], strides = [1, 1]} : vector<8x96xf32> to vector<1x32xf32>
    %167 = vector.extract_strided_slice %159 {offsets = [7, 0], sizes = [1, 32], strides = [1, 1]} : vector<8x96xf32> to vector<1x32xf32>
    %cst_63 = arith.constant dense<0.000000e+00> : vector<16x96xf32>
    %168 = tpu.matmul %149, %151, %cst_63 {dimension_numbers = #tpu.dot_dimension_numbers<[1], [0], [0], [1], [0, 0, 1, 1], [], []>} : vector<16x32xf32>, vector<32x96xf32>, vector<16x96xf32> -> vector<16x96xf32>
    %169 = vector.broadcast %160 : vector<1x96xf32> to vector<16x96xf32>
    %170 = arith.addf %168, %169 : vector<16x96xf32>
    %171 = vector.extract_strided_slice %170 {offsets = [0, 0], sizes = [16, 32], strides = [1, 1]} : vector<16x96xf32> to vector<16x32xf32>
    %cst_64 = arith.constant 0.353553385 : f32
    %172 = vector.broadcast %cst_64 : f32 to vector<16x32xf32>
    %173 = arith.mulf %171, %172 : vector<16x32xf32>
    %174 = vector.extract_strided_slice %170 {offsets = [0, 32], sizes = [16, 32], strides = [1, 1]} : vector<16x96xf32> to vector<16x32xf32>
    %175 = vector.extract_strided_slice %170 {offsets = [0, 64], sizes = [16, 32], strides = [1, 1]} : vector<16x96xf32> to vector<16x32xf32>
    %176 = vector.extract_strided_slice %173 {offsets = [0, 0], sizes = [16, 8], strides = [1, 1]} : vector<16x32xf32> to vector<16x8xf32>
    %177 = vector.extract_strided_slice %174 {offsets = [0, 0], sizes = [16, 8], strides = [1, 1]} : vector<16x32xf32> to vector<16x8xf32>
    "tpu.trace_start"() <{level = 10 : i32, message = "qd,kd->qk"}> : () -> ()
    %cst_65 = arith.constant dense<0.000000e+00> : vector<16x16xf32>
    %178 = tpu.matmul %176, %177, %cst_65 {dimension_numbers = #tpu.dot_dimension_numbers<[1], [1], [0], [0], [0, 0, 1, 0], [], []>} : vector<16x8xf32>, vector<16x8xf32>, vector<16x16xf32> -> vector<16x16xf32>
    "tpu.trace_stop"() : () -> ()
    %179 = arith.addf %178, %1 : vector<16x16xf32>
    %cst_66 = arith.constant dense<0xFF800000> : vector<16xf32>
    %180 = vector.multi_reduction <maximumf>, %179, %cst_66 [1] : vector<16x16xf32> to vector<16xf32>
    %181 = vector.shape_cast %180 : vector<16xf32> to vector<16x1xf32>
    %182 = vector.broadcast %181 : vector<16x1xf32> to vector<16x16xf32>
    %183 = arith.subf %179, %182 : vector<16x16xf32>
    %184 = math.exp %183 : vector<16x16xf32>
    %cst_67 = arith.constant dense<0.000000e+00> : vector<16xf32>
    %185 = vector.multi_reduction <add>, %184, %cst_67 [1] : vector<16x16xf32> to vector<16xf32>
    %186 = vector.shape_cast %185 : vector<16xf32> to vector<16x1xf32>
    %187 = tpu.reciprocal %186 {approx = true} : vector<16x1xf32> -> vector<16x1xf32>
    %188 = vector.broadcast %187 : vector<16x1xf32> to vector<16x16xf32>
    %189 = arith.mulf %184, %188 : vector<16x16xf32>
    %190 = vector.extract_strided_slice %175 {offsets = [0, 0], sizes = [16, 8], strides = [1, 1]} : vector<16x32xf32> to vector<16x8xf32>
    %cst_68 = arith.constant dense<0.000000e+00> : vector<16x8xf32>
    %191 = tpu.matmul %189, %190, %cst_68 {dimension_numbers = #tpu.dot_dimension_numbers<[1], [0], [0], [1], [0, 0, 1, 1], [], []>} : vector<16x16xf32>, vector<16x8xf32>, vector<16x8xf32> -> vector<16x8xf32>
    %192 = vector.extract_strided_slice %173 {offsets = [0, 8], sizes = [16, 8], strides = [1, 1]} : vector<16x32xf32> to vector<16x8xf32>
    %193 = vector.extract_strided_slice %174 {offsets = [0, 8], sizes = [16, 8], strides = [1, 1]} : vector<16x32xf32> to vector<16x8xf32>
    "tpu.trace_start"() <{level = 10 : i32, message = "qd,kd->qk"}> : () -> ()
    %cst_69 = arith.constant dense<0.000000e+00> : vector<16x16xf32>
    %194 = tpu.matmul %192, %193, %cst_69 {dimension_numbers = #tpu.dot_dimension_numbers<[1], [1], [0], [0], [0, 0, 1, 0], [], []>} : vector<16x8xf32>, vector<16x8xf32>, vector<16x16xf32> -> vector<16x16xf32>
    "tpu.trace_stop"() : () -> ()
    %195 = arith.addf %194, %1 : vector<16x16xf32>
    %cst_70 = arith.constant dense<0xFF800000> : vector<16xf32>
    %196 = vector.multi_reduction <maximumf>, %195, %cst_70 [1] : vector<16x16xf32> to vector<16xf32>
    %197 = vector.shape_cast %196 : vector<16xf32> to vector<16x1xf32>
    %198 = vector.broadcast %197 : vector<16x1xf32> to vector<16x16xf32>
    %199 = arith.subf %195, %198 : vector<16x16xf32>
    %200 = math.exp %199 : vector<16x16xf32>
    %cst_71 = arith.constant dense<0.000000e+00> : vector<16xf32>
    %201 = vector.multi_reduction <add>, %200, %cst_71 [1] : vector<16x16xf32> to vector<16xf32>
    %202 = vector.shape_cast %201 : vector<16xf32> to vector<16x1xf32>
    %203 = tpu.reciprocal %202 {approx = true} : vector<16x1xf32> -> vector<16x1xf32>
    %204 = vector.broadcast %203 : vector<16x1xf32> to vector<16x16xf32>
    %205 = arith.mulf %200, %204 : vector<16x16xf32>
    %206 = vector.extract_strided_slice %175 {offsets = [0, 8], sizes = [16, 8], strides = [1, 1]} : vector<16x32xf32> to vector<16x8xf32>
    %cst_72 = arith.constant dense<0.000000e+00> : vector<16x8xf32>
    %207 = tpu.matmul %205, %206, %cst_72 {dimension_numbers = #tpu.dot_dimension_numbers<[1], [0], [0], [1], [0, 0, 1, 1], [], []>} : vector<16x16xf32>, vector<16x8xf32>, vector<16x8xf32> -> vector<16x8xf32>
    %208 = vector.extract_strided_slice %173 {offsets = [0, 16], sizes = [16, 8], strides = [1, 1]} : vector<16x32xf32> to vector<16x8xf32>
    %209 = vector.extract_strided_slice %174 {offsets = [0, 16], sizes = [16, 8], strides = [1, 1]} : vector<16x32xf32> to vector<16x8xf32>
    "tpu.trace_start"() <{level = 10 : i32, message = "qd,kd->qk"}> : () -> ()
    %cst_73 = arith.constant dense<0.000000e+00> : vector<16x16xf32>
    %210 = tpu.matmul %208, %209, %cst_73 {dimension_numbers = #tpu.dot_dimension_numbers<[1], [1], [0], [0], [0, 0, 1, 0], [], []>} : vector<16x8xf32>, vector<16x8xf32>, vector<16x16xf32> -> vector<16x16xf32>
    "tpu.trace_stop"() : () -> ()
    %211 = arith.addf %210, %1 : vector<16x16xf32>
    %cst_74 = arith.constant dense<0xFF800000> : vector<16xf32>
    %212 = vector.multi_reduction <maximumf>, %211, %cst_74 [1] : vector<16x16xf32> to vector<16xf32>
    %213 = vector.shape_cast %212 : vector<16xf32> to vector<16x1xf32>
    %214 = vector.broadcast %213 : vector<16x1xf32> to vector<16x16xf32>
    %215 = arith.subf %211, %214 : vector<16x16xf32>
    %216 = math.exp %215 : vector<16x16xf32>
    %cst_75 = arith.constant dense<0.000000e+00> : vector<16xf32>
    %217 = vector.multi_reduction <add>, %216, %cst_75 [1] : vector<16x16xf32> to vector<16xf32>
    %218 = vector.shape_cast %217 : vector<16xf32> to vector<16x1xf32>
    %219 = tpu.reciprocal %218 {approx = true} : vector<16x1xf32> -> vector<16x1xf32>
    %220 = vector.broadcast %219 : vector<16x1xf32> to vector<16x16xf32>
    %221 = arith.mulf %216, %220 : vector<16x16xf32>
    %222 = vector.extract_strided_slice %175 {offsets = [0, 16], sizes = [16, 8], strides = [1, 1]} : vector<16x32xf32> to vector<16x8xf32>
    %cst_76 = arith.constant dense<0.000000e+00> : vector<16x8xf32>
    %223 = tpu.matmul %221, %222, %cst_76 {dimension_numbers = #tpu.dot_dimension_numbers<[1], [0], [0], [1], [0, 0, 1, 1], [], []>} : vector<16x16xf32>, vector<16x8xf32>, vector<16x8xf32> -> vector<16x8xf32>
    %224 = vector.extract_strided_slice %173 {offsets = [0, 24], sizes = [16, 8], strides = [1, 1]} : vector<16x32xf32> to vector<16x8xf32>
    %225 = vector.extract_strided_slice %174 {offsets = [0, 24], sizes = [16, 8], strides = [1, 1]} : vector<16x32xf32> to vector<16x8xf32>
    "tpu.trace_start"() <{level = 10 : i32, message = "qd,kd->qk"}> : () -> ()
    %cst_77 = arith.constant dense<0.000000e+00> : vector<16x16xf32>
    %226 = tpu.matmul %224, %225, %cst_77 {dimension_numbers = #tpu.dot_dimension_numbers<[1], [1], [0], [0], [0, 0, 1, 0], [], []>} : vector<16x8xf32>, vector<16x8xf32>, vector<16x16xf32> -> vector<16x16xf32>
    "tpu.trace_stop"() : () -> ()
    %227 = arith.addf %226, %1 : vector<16x16xf32>
    %cst_78 = arith.constant dense<0xFF800000> : vector<16xf32>
    %228 = vector.multi_reduction <maximumf>, %227, %cst_78 [1] : vector<16x16xf32> to vector<16xf32>
    %229 = vector.shape_cast %228 : vector<16xf32> to vector<16x1xf32>
    %230 = vector.broadcast %229 : vector<16x1xf32> to vector<16x16xf32>
    %231 = arith.subf %227, %230 : vector<16x16xf32>
    %232 = math.exp %231 : vector<16x16xf32>
    %cst_79 = arith.constant dense<0.000000e+00> : vector<16xf32>
    %233 = vector.multi_reduction <add>, %232, %cst_79 [1] : vector<16x16xf32> to vector<16xf32>
    %234 = vector.shape_cast %233 : vector<16xf32> to vector<16x1xf32>
    %235 = tpu.reciprocal %234 {approx = true} : vector<16x1xf32> -> vector<16x1xf32>
    %236 = vector.broadcast %235 : vector<16x1xf32> to vector<16x16xf32>
    %237 = arith.mulf %232, %236 : vector<16x16xf32>
    %238 = vector.extract_strided_slice %175 {offsets = [0, 24], sizes = [16, 8], strides = [1, 1]} : vector<16x32xf32> to vector<16x8xf32>
    %cst_80 = arith.constant dense<0.000000e+00> : vector<16x8xf32>
    %239 = tpu.matmul %237, %238, %cst_80 {dimension_numbers = #tpu.dot_dimension_numbers<[1], [0], [0], [1], [0, 0, 1, 1], [], []>} : vector<16x16xf32>, vector<16x8xf32>, vector<16x8xf32> -> vector<16x8xf32>
    %240 = tpu.concatenate %191, %207, %223, %239 in 1 : vector<16x8xf32>, vector<16x8xf32>, vector<16x8xf32>, vector<16x8xf32> -> vector<16x32xf32>
    %cst_81 = arith.constant dense<0.000000e+00> : vector<16x32xf32>
    %241 = tpu.matmul %240, %153, %cst_81 {dimension_numbers = #tpu.dot_dimension_numbers<[1], [0], [0], [1], [0, 0, 1, 1], [], []>} : vector<16x32xf32>, vector<32x32xf32>, vector<16x32xf32> -> vector<16x32xf32>
    %242 = vector.broadcast %161 : vector<1x32xf32> to vector<16x32xf32>
    %243 = arith.addf %241, %242 : vector<16x32xf32>
    %244 = arith.addf %149, %243 : vector<16x32xf32>
    %cst_82 = arith.constant dense<0.000000e+00> : vector<16xf32>
    %245 = vector.multi_reduction <add>, %244, %cst_82 [1] : vector<16x32xf32> to vector<16xf32>
    %246 = vector.shape_cast %245 : vector<16xf32> to vector<16x1xf32>
    %cst_83 = arith.constant 3.200000e+01 : f32
    %247 = vector.broadcast %cst_83 : f32 to vector<16x1xf32>
    %248 = arith.divf %246, %247 : vector<16x1xf32>
    %249 = vector.broadcast %248 : vector<16x1xf32> to vector<16x32xf32>
    %250 = arith.subf %244, %249 : vector<16x32xf32>
    %251 = arith.mulf %250, %250 : vector<16x32xf32>
    %cst_84 = arith.constant dense<0.000000e+00> : vector<16xf32>
    %252 = vector.multi_reduction <add>, %251, %cst_84 [1] : vector<16x32xf32> to vector<16xf32>
    %253 = vector.shape_cast %252 : vector<16xf32> to vector<16x1xf32>
    %cst_85 = arith.constant 3.200000e+01 : f32
    %254 = vector.broadcast %cst_85 : f32 to vector<16x1xf32>
    %255 = arith.divf %253, %254 : vector<16x1xf32>
    %256 = vector.broadcast %248 : vector<16x1xf32> to vector<16x32xf32>
    %257 = arith.subf %244, %256 : vector<16x32xf32>
    %cst_86 = arith.constant 9.99999974E-6 : f32
    %258 = vector.broadcast %cst_86 : f32 to vector<16x1xf32>
    %259 = arith.addf %255, %258 : vector<16x1xf32>
    %260 = math.rsqrt %259 : vector<16x1xf32>
    %261 = vector.broadcast %260 : vector<16x1xf32> to vector<16x32xf32>
    %262 = arith.mulf %257, %261 : vector<16x32xf32>
    %263 = vector.broadcast %164 : vector<1x32xf32> to vector<16x32xf32>
    %264 = arith.mulf %262, %263 : vector<16x32xf32>
    %265 = vector.broadcast %165 : vector<1x32xf32> to vector<16x32xf32>
    %266 = arith.addf %264, %265 : vector<16x32xf32>
    %cst_87 = arith.constant dense<0.000000e+00> : vector<16x64xf32>
    %267 = tpu.matmul %266, %155, %cst_87 {dimension_numbers = #tpu.dot_dimension_numbers<[1], [0], [0], [1], [0, 0, 1, 1], [], []>} : vector<16x32xf32>, vector<32x64xf32>, vector<16x64xf32> -> vector<16x64xf32>
    %268 = vector.broadcast %162 : vector<1x64xf32> to vector<16x64xf32>
    %269 = arith.addf %267, %268 : vector<16x64xf32>
    %cst_88 = arith.constant 0.000000e+00 : f32
    %270 = vector.broadcast %cst_88 : f32 to vector<16x64xf32>
    %271 = arith.maximumf %269, %270 : vector<16x64xf32>
    %cst_89 = arith.constant dense<0.000000e+00> : vector<16x32xf32>
    %272 = tpu.matmul %271, %157, %cst_89 {dimension_numbers = #tpu.dot_dimension_numbers<[1], [0], [0], [1], [0, 0, 1, 1], [], []>} : vector<16x64xf32>, vector<64x32xf32>, vector<16x32xf32> -> vector<16x32xf32>
    %273 = vector.broadcast %163 : vector<1x32xf32> to vector<16x32xf32>
    %274 = arith.addf %272, %273 : vector<16x32xf32>
    %275 = arith.addf %266, %274 : vector<16x32xf32>
    %cst_90 = arith.constant dense<0.000000e+00> : vector<16xf32>
    %276 = vector.multi_reduction <add>, %275, %cst_90 [1] : vector<16x32xf32> to vector<16xf32>
    %277 = vector.shape_cast %276 : vector<16xf32> to vector<16x1xf32>
    %cst_91 = arith.constant 3.200000e+01 : f32
    %278 = vector.broadcast %cst_91 : f32 to vector<16x1xf32>
    %279 = arith.divf %277, %278 : vector<16x1xf32>
    %280 = vector.broadcast %279 : vector<16x1xf32> to vector<16x32xf32>
    %281 = arith.subf %275, %280 : vector<16x32xf32>
    %282 = arith.mulf %281, %281 : vector<16x32xf32>
    %cst_92 = arith.constant dense<0.000000e+00> : vector<16xf32>
    %283 = vector.multi_reduction <add>, %282, %cst_92 [1] : vector<16x32xf32> to vector<16xf32>
    %284 = vector.shape_cast %283 : vector<16xf32> to vector<16x1xf32>
    %cst_93 = arith.constant 3.200000e+01 : f32
    %285 = vector.broadcast %cst_93 : f32 to vector<16x1xf32>
    %286 = arith.divf %284, %285 : vector<16x1xf32>
    %287 = vector.broadcast %279 : vector<16x1xf32> to vector<16x32xf32>
    %288 = arith.subf %275, %287 : vector<16x32xf32>
    %cst_94 = arith.constant 9.99999974E-6 : f32
    %289 = vector.broadcast %cst_94 : f32 to vector<16x1xf32>
    %290 = arith.addf %286, %289 : vector<16x1xf32>
    %291 = math.rsqrt %290 : vector<16x1xf32>
    %292 = vector.broadcast %291 : vector<16x1xf32> to vector<16x32xf32>
    %293 = arith.mulf %288, %292 : vector<16x32xf32>
    %294 = vector.broadcast %166 : vector<1x32xf32> to vector<16x32xf32>
    %295 = arith.mulf %293, %294 : vector<16x32xf32>
    %296 = vector.broadcast %167 : vector<1x32xf32> to vector<16x32xf32>
    %297 = arith.addf %295, %296 : vector<16x32xf32>
    %c0_95 = arith.constant 0 : index
    %c0_96 = arith.constant 0 : index
    %298 = vector.load %arg7[%c0_95, %c0_96] : memref<32x8xf32, #tpu.memory_space<vmem>>, vector<32x8xf32>
    %cst_97 = arith.constant dense<0.000000e+00> : vector<16x8xf32>
    %299 = tpu.matmul %297, %298, %cst_97 {dimension_numbers = #tpu.dot_dimension_numbers<[1], [0], [0], [1], [0, 0, 1, 1], [], []>} : vector<16x32xf32>, vector<32x8xf32>, vector<16x8xf32> -> vector<16x8xf32>
    %c0_98 = arith.constant 0 : index
    %c0_99 = arith.constant 0 : index
    %300 = vector.load %arg8[%c0_98, %c0_99] : memref<1x8xf32, #tpu.memory_space<vmem>>, vector<1x8xf32>
    %301 = vector.broadcast %300 : vector<1x8xf32> to vector<16x8xf32>
    %302 = arith.addf %299, %301 : vector<16x8xf32>
    %c0_100 = arith.constant 0 : index
    %c0_101 = arith.constant 0 : index
    %303 = vector.load %arg9[%c0_100, %c0_101] : memref<16x8xf32, #tpu.memory_space<vmem>>, vector<16x8xf32>
    tpu.vector_store %arg9[%c0_100, %c0_101], %302 {strides = array<i32>} : memref<16x8xf32, #tpu.memory_space<vmem>>, vector<16x8xf32>,
    return
  }
}

</mosaic_0001>

<bundles_post_ra>
// kernel: my_transformer_forward.1
= control target key start
LH: loop header
LB: loop body
LE: loop exit
PB: predicated region body
PF: predicated region fallthrough
CT: control target
= control target key end

     0   :  { %14 = vsyncpa [#allocation3], 0  ;;  %s3924_s0 = inlined_call_operand.vmem [shape: f32[16,32], index: 0, kind: input, shape index: {}]   ;;  %s3925_s1 = inlined_call_operand.vmem [shape: f32[16,16], index: 1, kind: input, shape index: {}]   ;;  %s3926_s2 = inlined_call_operand.vmem [shape: f32[2,32,96], index: 2, kind: input, shape index: {}]   ;;  %s3927_s3 = inlined_call_operand.vmem [shape: f32[2,32,32], index: 3, kind: input, shape index: {}]   ;;  %s3928_s4 = inlined_call_operand.vmem [shape: f32[2,32,64], index: 4, kind: input, shape index: {}]   ;;  %s3929_s5 = inlined_call_operand.vmem [shape: f32[2,64,32], index: 5, kind: input, shape index: {}]   ;;  %s3930_s6 = inlined_call_operand.hbm [shape: f32[2,8,96], index: 6, kind: input, shape index: {}]   ;;  %s3931_s7 = inlined_call_operand.vmem [shape: f32[32,8], index: 7, kind: input, shape index: {}]   ;;  %s3932_s8 = inlined_call_operand.vmem [shape: f32[1,8], index: 8, kind: input, shape index: {}]   ;;  %s3933_s9 = inlined_call_operand.hbm [shape: f32[16,8], index: 9, kind: output, shape index: {}]  }
   0x1   :  { %15 = vsyncpa [#allocation4], 0  ;;  %s3306_s30 = smov [#allocation2]  }
   0x2   :  { %s33_s10 = sshll.u32 %s3306_s30, 4  ;;  %s34_s10 = int_to_ptr.vmem [resolvable:$true] %s33_s10 }
   0x3   :  { %s3270_s11 = scalar_lea.vmem %s34_s10, 256  ;;  %p3275_p1 = scmp.lt.s32.totalorder %s34_s10, %s34_s10 }
   0x4   :  { %p3271_p0 = scmp.ne.s32.totalorder %s34_s10, %s3270_s11  ;;  %p3276_p2 = scmp.lt.s32.totalorder %s3270_s11, %s3270_s11 }
   0x6   :  { %p3277_p3 = por %p3276_p2, %p3275_p1 }
   0x8   :  { %p3278_p4 = pnand %p3277_p3, %p3271_p0 }
   0xa   :  { %3281 = shalt.err (!%p3278_p4)
}
   0xb   :  { %s3307_s12 = smov 128   ;;  %s3308_s13 = smov 8  }
   0xc   :  { %39 = dma.hbm_to_vmem [thread:$0]  %s3930_s6, 256, %s34_s10, [#allocation3], %s3307_s12, %s3307_s12, %s3308_s13  }
   0xd   :  { %3302 = dma.done.wait [#allocation3], 256  }
   0xe   :  { %3303 = vsyncadd [#allocation3], 4294967040  ;;  %vm76_vm0 = vcmask 261120   ;;  %v54_v0 = vld [vmem:[%s3926_s2 + $0x18] sm:$0xff]  ;;  %v53_v1 = vld [vmem:[%s3926_s2 + $0x10] sm:$0xff]  ;;  %v72_v6 = vlaneseq  ;;  %vm166_vm1 = vcmask 64512  }
   0xf   :  { %2936 = vmatprep.subr.mxu0 %v54_v0  ;;  %v3388_v2 = vld [vmem:[%s3924_s0] sm:$0xff]  ;;  %v52_v3 = vld [vmem:[%s3926_s2 + $0x8] sm:$0xff]  ;;  %vm252_vm2 = vcmask 130048   ;;  %s3310_s10 = smov 64   ;;  %s3311_s11 = smov 120   ;;  %vm990_vm3 = vcmask 195584  }
  0x10   :  { %2937 = vmatpush3.msra.mxu0 %v54_v0  ;;  %2944 = vmatprep.mubr.msk.f32.mxu0 %vm76_vm0, %v3388_v2  ;;  %v51_v4 = vld [vmem:[%s3926_s2] sm:$0xff]  ;;  %v3401_v5 = vld [vmem:[%s3924_s0 + $0x8] sm:$0xff]  ;;  %v3405_v7 = vshrl.u32 %v72_v6, 7  ;;  %s3309_s0 = smov 96   ;;  %s3312_s14 = smov 88   ;;  %vm1210_vm4 = vcmask 523264  }
  0x11   :  { %2938 = vmatprep.subr.mxu0 %v53_v1  ;;  %v3408_v9 = vld [vmem:[#allocation2] sm:$0xff]  ;;  %v3443_v21 = vld [vmem:[%s3925_s1 + $0x8] sm:$0xff]  ;;  %s3313_s15 = smov 56   ;;  %s3314_s16 = smov 80  }
  0x12   :  { %2939 = vmatpush3.msra.mxu0 %v53_v1  ;;  %v74_v8 = vsub.s32 0, %v3405_v7  ;;  %v3438_v20 = vld [vmem:[%s3925_s1] sm:$0xff]  ;;  %s3315_s17 = smov 112   ;;  %s3316_s18 = smov 48  }
  0x13   :  { %2940 = vmatprep.subr.mxu0 %v52_v3  ;;  %s3317_s19 = smov 72   ;;  %s3318_s20 = smov 104  }
  0x14   :  { %2941 = vmatpush3.msra.mxu0 %v52_v3  ;;  %v75_v10 = vrot.slane %v3408_v9, %v74_v8  ;;  %s3319_s21 = smov 40   ;;  %s3320_s22 = smov 16  }
  0x15   :  { %2942 = vmatprep.subr.mxu0 %v51_v4  ;;  %s3321_s30 = smov 24   ;;  %s3322_s25 = smov [#allocation5]  }
  0x16   :  { %2943 = vmatpush3.msra.mxu0 %v51_v4  ;;  %s2711_s26 = sshll.u32 %s3322_s25, 4  ;;  %s2712_s26 = int_to_ptr.vmem [resolvable:$true] %s2711_s26 }
  0x17   :  { %2945 = vmatmul.mubr.msk.f32.vlgmr.msra.gmra.mxu0 %vm76_vm0, %v3401_v5  ;;  %s3282_s27 = scalar_lea.vmem %s2712_s26, 256  ;;  %p3287_p6 = scmp.lt.s32.totalorder %s2712_s26, %s2712_s26 }
  0x18   :  { %p3283_p5 = scmp.ne.s32.totalorder %s2712_s26, %s3282_s27  ;;  %p3288_p7 = scmp.lt.s32.totalorder %s3282_s27, %s3282_s27 }
  0x1a   :  { %p3289_p8 = por %p3288_p7, %p3287_p6 }
  0x1c   :  { %p3290_p9 = pnand %p3289_p8, %p3283_p5 }
  0xd7   :  { %v2946_v11 = vpop.f32.mrf.mxu0 }
  0xd8   :  { %v3413_v12 = vadd.f32 %v2946_v11, %v75_v10 }
  0xd9   :  { %v149_v13 = vpop.f32.mrf.mxu0 }
  0xda   :  { %v3415_v14 = vadd.f32 %v149_v13, %v75_v10  ;;  %164 = vrot.lane.b32.xlu0 %v3413_v12, %s3309_s0  ;;  %v3431_v18 = vmul.f32 0.35355338, %v3413_v12 }
  0xdc   :  { %v3420_v15 = vmul.f32 0.35355338, %v3415_v14 }
  0xde   :  { %162 = vrot.lane.b32.xlu0 %v3415_v14, %s3309_s0  ;;  %2951 = vmatprep.mubr.msk.f32.mxu1 %vm166_vm1, %v3420_v15 }
 0x14c   :  { %v165_v16 = vpop.permute.xlu0 %164 }
 0x14d   :  { %2947 = vmatprep.subr.msk.mxu1 %vm166_vm1, %v165_v16 }
 0x14e   :  { %2948 = vmatpush3.xpose.msk.msra.mxu1 %vm166_vm1, %v165_v16 }
 0x150   :  { %v163_v17 = vpop.permute.xlu0 %162 }
 0x151   :  { %2949 = vmatprep.subr.msk.mxu1 %vm166_vm1, %v163_v17 }
 0x152   :  { %2950 = vmatpush3.xpose.msk.msra.mxu1 %vm166_vm1, %v163_v17 }
 0x155   :  { %2952 = vmatmul.mubr.msk.f32.vlgmr.msra.gmra.mxu1 %vm166_vm1, %v3431_v18 }
 0x215   :  { %v2953_v19 = vpop.f32.mrf.mxu1 }
 0x216   :  { %v249_v24 = vadd.f32 %v2953_v19, %v3443_v21 }
 0x217   :  { %v243_v22 = vpop.f32.mrf.mxu1 }
 0x218   :  { %v244_v23 = vadd.f32 %v243_v22, %v3438_v20  ;;  %v256_v26 = vsel %vm252_vm2, %v249_v24, -inf }
 0x21a   :  { %v253_v25 = vsel %vm252_vm2, %v244_v23, -inf }
 0x21b   :  { %254 = vmax.xlane.f32.xlu1 %v253_v25 }
 0x21f   :  { %257 = vmax.xlane.f32.xlu1 %v256_v26 }
 0x2a4   :  { %v255_v27 = vpop.xlane.xlu1 %254 }
 0x2a5   :  { %v259_v28 = vsub.f32 %v244_v23, %v255_v27 }
 0x2a7   :  { %v261_v29 = vmul.f32 1.442695, %v259_v28 }
 0x2a8   :  { %v258_v30 = vpop.xlane.xlu1 %257 }
 0x2a9   :  { %3180 = vpow2.f32 %v261_v29  ;;  %v260_v31 = vsub.f32 %v249_v24, %v258_v30 }
 0x2ab   :  { %v263_v32 = vmul.f32 1.442695, %v260_v31 }
 0x2ad   :  { %3182 = vpow2.f32 %v263_v32 }
 0x2b6   :  { %v3181_v33 = vpop.eup %3180 }
 0x2b7   :  { %v265_v34 = vsel %vm252_vm2, %v3181_v33, 0.0 }
 0x2b8   :  { %266 = vadd.xlane.f32.xlu0 %v265_v34 }
 0x2ba   :  { %v3183_v35 = vpop.eup %3182 }
 0x2bb   :  { %v268_v36 = vsel %vm252_vm2, %v3183_v35, 0.0 }
 0x2bc   :  { %269 = vadd.xlane.f32.xlu1 %v268_v36 }
 0x2cd   :  { %277 = vrot.lane.b32.xlu1 %v3413_v12, %s3310_s10 }
 0x2ce   :  { %362 = vrot.lane.b32.xlu0 %v3420_v15, %s3311_s11 }
 0x2d1   :  { %275 = vrot.lane.b32.xlu1 %v3415_v14, %s3310_s10 }
 0x2d5   :  { %368 = vrot.lane.b32.xlu1 %v3413_v12, %s3312_s14 }
 0x2d9   :  { %366 = vrot.lane.b32.xlu1 %v3415_v14, %s3312_s14 }
 0x2dd   :  { %364 = vrot.lane.b32.xlu1 %v3431_v18, %s3311_s11 }
 0x341   :  { %v267_v37 = vpop.xlane.xlu0 %266 }
 0x342   :  { %3184 = vrcp.f32 %v267_v37 }
 0x345   :  { %v270_v38 = vpop.xlane.xlu1 %269  ;;  %v363_v47 = vpop.permute.xlu0 %362 }
 0x346   :  { %3186 = vrcp.f32 %v270_v38 }
 0x349   :  { %v278_v39 = vpop.permute.xlu1 %277 }
 0x34a   :  { %2954 = vmatprep.subr.mxu1 %v278_v39 }
 0x34b   :  { %2955 = vmatpush3.msra.mxu1 %v278_v39 }
 0x34d   :  { %v276_v40 = vpop.permute.xlu1 %275 }
 0x34e   :  { %2956 = vmatprep.subr.mxu1 %v276_v40 }
 0x34f   :  { %v3185_v41 = vpop.eup %3184  ;;  %2957 = vmatpush3.msra.mxu1 %v276_v40 }
 0x350   :  { %v273_v42 = vmul.f32 %v3185_v41, %v3181_v33 }
 0x351   :  { %v369_v43 = vpop.permute.xlu1 %368 }
 0x352   :  { %2958 = vmatprep.mubr.msk.f32.mxu1 %vm252_vm2, %v273_v42  ;;  %2961 = vmatprep.subr.msk.mxu1 %vm166_vm1, %v369_v43 }
 0x353   :  { %v3187_v44 = vpop.eup %3186 }
 0x354   :  { %v274_v45 = vmul.f32 %v3187_v44, %v3183_v35 }
 0x355   :  { %v367_v46 = vpop.permute.xlu1 %366 }
 0x356   :  { %2959 = vmatmul.mubr.msk.f32.vlgmr.msra.gmra.mxu1 %vm252_vm2, %v274_v45 }
 0x357   :  { %2962 = vmatpush3.xpose.msk.msra.mxu1 %vm166_vm1, %v369_v43  ;;  %2965 = vmatprep.mubr.msk.f32.mxu1 %vm166_vm1, %v363_v47 }
 0x358   :  { %2963 = vmatprep.subr.msk.mxu1 %vm166_vm1, %v367_v46 }
 0x359   :  { %v365_v48 = vpop.permute.xlu1 %364 }
 0x35b   :  { %2964 = vmatpush3.xpose.msk.msra.mxu1 %vm166_vm1, %v367_v46 }
 0x35e   :  { %2966 = vmatmul.mubr.msk.f32.vlgmr.msra.gmra.mxu1 %vm166_vm1, %v365_v48 }
 0x416   :  { %v3471_v49 = vpop.f32.mrf.mxu1 }
 0x418   :  { %v3473_v50 = vpop.f32.mrf.mxu1 }
 0x41e   :  { %v2967_v51 = vpop.f32.mrf.mxu1 }
 0x41f   :  { %v450_v52 = vadd.f32 %v2967_v51, %v3443_v21 }
 0x420   :  { %v444_v53 = vpop.f32.mrf.mxu1 }
 0x421   :  { %v445_v54 = vadd.f32 %v444_v53, %v3438_v20  ;;  %v456_v55 = vsel %vm252_vm2, %v450_v52, -inf }
 0x422   :  { %457 = vmax.xlane.f32.xlu0 %v456_v55 }
 0x423   :  { %v453_v56 = vsel %vm252_vm2, %v445_v54, -inf }
 0x424   :  { %454 = vmax.xlane.f32.xlu1 %v453_v56 }
 0x435   :  { %477 = vrot.lane.b32.xlu1 %v3413_v12, %s3313_s15 }
 0x438   :  { %475 = vrot.lane.b32.xlu0 %v3415_v14, %s3313_s15 }
 0x439   :  { %568 = vrot.lane.b32.xlu1 %v3413_v12, %s3314_s16 }
 0x43c   :  { %562 = vrot.lane.b32.xlu0 %v3420_v15, %s3315_s17 }
 0x43d   :  { %566 = vrot.lane.b32.xlu1 %v3415_v14, %s3314_s16 }
 0x4ab   :  { %v458_v57 = vpop.xlane.xlu0 %457 }
 0x4ac   :  { %v460_v58 = vsub.f32 %v450_v52, %v458_v57 }
 0x4ad   :  { %v455_v59 = vpop.xlane.xlu1 %454 }
 0x4ae   :  { %v463_v60 = vmul.f32 1.442695, %v460_v58  ;;  %v459_v61 = vsub.f32 %v445_v54, %v455_v59 }
 0x4af   :  { %v476_v0 = vpop.permute.xlu0 %475 }
 0x4b0   :  { %3188 = vpow2.f32 %v463_v60  ;;  %v461_v62 = vmul.f32 1.442695, %v459_v61 }
 0x4b1   :  { %v478_v63 = vpop.permute.xlu1 %477 }
 0x4b2   :  { %3190 = vpow2.f32 %v461_v62  ;;  %2968 = vmatprep.subr.mxu0 %v478_v63 }
 0x4b3   :  { %2969 = vmatpush3.msra.mxu0 %v478_v63  ;;  %v563_v24 = vpop.permute.xlu0 %562 }
 0x4b4   :  { %2970 = vmatprep.subr.mxu0 %v476_v0 }
 0x4b5   :  { %2971 = vmatpush3.msra.mxu0 %v476_v0  ;;  %v569_v1 = vpop.permute.xlu1 %568 }
 0x4b6   :  { %2975 = vmatprep.subr.msk.mxu0 %vm166_vm1, %v569_v1 }
 0x4b9   :  { %v567_v11 = vpop.permute.xlu1 %566 }
 0x4bd   :  { %v3189_v3 = vpop.eup %3188 }
 0x4be   :  { %v468_v4 = vsel %vm252_vm2, %v3189_v3, 0.0 }
 0x4bf   :  { %v3191_v6 = vpop.eup %3190  ;;  %469 = vadd.xlane.f32.xlu1 %v468_v4 }
 0x4c0   :  { %v465_v10 = vsel %vm252_vm2, %v3191_v6, 0.0 }
 0x4c3   :  { %466 = vadd.xlane.f32.xlu1 %v465_v10 }
 0x4d4   :  { %564 = vrot.lane.b32.xlu1 %v3431_v18, %s3315_s17 }
 0x548   :  { %v470_v13 = vpop.xlane.xlu1 %469 }
 0x549   :  { %3192 = vrcp.f32 %v470_v13 }
 0x54c   :  { %v467_v16 = vpop.xlane.xlu1 %466 }
 0x54d   :  { %3194 = vrcp.f32 %v467_v16 }
 0x550   :  { %v565_v25 = vpop.permute.xlu1 %564 }
 0x556   :  { %v3193_v17 = vpop.eup %3192 }
 0x557   :  { %v474_v23 = vmul.f32 %v3193_v17, %v3189_v3 }
 0x55a   :  { %v3195_v19 = vpop.eup %3194 }
 0x55b   :  { %v473_v22 = vmul.f32 %v3195_v19, %v3191_v6 }
 0x55d   :  { %2972 = vmatprep.mubr.msk.f32.mxu0 %vm252_vm2, %v473_v22 }
 0x55e   :  { %2973 = vmatmul.mubr.msk.f32.vlgmr.msra.gmra.mxu0 %vm252_vm2, %v474_v23 }
 0x55f   :  { %2976 = vmatpush3.xpose.msk.msra.mxu0 %vm166_vm1, %v569_v1  ;;  %2979 = vmatprep.mubr.msk.f32.mxu0 %vm166_vm1, %v563_v24 }
 0x560   :  { %2977 = vmatprep.subr.msk.mxu0 %vm166_vm1, %v567_v11 }
 0x563   :  { %2978 = vmatpush3.xpose.msk.msra.mxu0 %vm166_vm1, %v567_v11 }
 0x566   :  { %2980 = vmatmul.mubr.msk.f32.vlgmr.msra.gmra.mxu0 %vm166_vm1, %v565_v25 }
 0x61e   :  { %v3501_v26 = vpop.f32.mrf.mxu0 }
 0x620   :  { %v3503_v27 = vpop.f32.mrf.mxu0 }
 0x626   :  { %v2981_v28 = vpop.f32.mrf.mxu0 }
 0x627   :  { %v650_v29 = vadd.f32 %v2981_v28, %v3443_v21  ;;  %v57_v28 = vld [vmem:[%s3927_s3 + $0x10] sm:$0xff] }
 0x628   :  { %v644_v30 = vpop.f32.mrf.mxu0 }
 0x629   :  { %v645_v31 = vadd.f32 %v644_v30, %v3438_v20  ;;  %v656_v32 = vsel %vm252_vm2, %v650_v29, -inf  ;;  %v55_v30 = vld [vmem:[%s3927_s3] sm:$0xff] }
 0x62a   :  { %657 = vmax.xlane.f32.xlu1 %v656_v32 }
 0x62b   :  { %v653_v33 = vsel %vm252_vm2, %v645_v31, -inf }
 0x62c   :  { %654 = vmax.xlane.f32.xlu0 %v653_v33 }
 0x63b   :  { %677 = vrot.lane.b32.xlu1 %v3413_v12, %s3316_s18 }
 0x63f   :  { %768 = vrot.lane.b32.xlu1 %v3413_v12, %s3317_s19 }
 0x643   :  { %766 = vrot.lane.b32.xlu1 %v3415_v14, %s3317_s19 }
 0x647   :  { %764 = vrot.lane.b32.xlu1 %v3431_v18, %s3318_s20 }
 0x6b3   :  { %v658_v34 = vpop.xlane.xlu1 %657 }
 0x6b4   :  { %v660_v35 = vsub.f32 %v650_v29, %v658_v34  ;;  %v56_v29 = vld [vmem:[%s3927_s3 + $0x8] sm:$0xff] }
 0x6b5   :  { %v655_v36 = vpop.xlane.xlu0 %654 }
 0x6b6   :  { %v663_v37 = vmul.f32 1.442695, %v660_v35  ;;  %v659_v38 = vsub.f32 %v645_v31, %v655_v36 }
 0x6b7   :  { %v678_v39 = vpop.permute.xlu1 %677 }
 0x6b8   :  { %3196 = vpow2.f32 %v663_v37  ;;  %v661_v40 = vmul.f32 1.442695, %v659_v38  ;;  %2982 = vmatprep.subr.mxu1 %v678_v39 }
 0x6b9   :  { %2983 = vmatpush3.msra.mxu1 %v678_v39 }
 0x6ba   :  { %3198 = vpow2.f32 %v661_v40 }
 0x6bb   :  { %v769_v47 = vpop.permute.xlu1 %768 }
 0x6c5   :  { %v3197_v41 = vpop.eup %3196 }
 0x6c6   :  { %v668_v42 = vsel %vm252_vm2, %v3197_v41, 0.0 }
 0x6c7   :  { %v3199_v43 = vpop.eup %3198  ;;  %669 = vadd.xlane.f32.xlu0 %v668_v42 }
 0x6c8   :  { %v665_v44 = vsel %vm252_vm2, %v3199_v43, 0.0 }
 0x6cb   :  { %666 = vadd.xlane.f32.xlu0 %v665_v44 }
 0x6e1   :  { %675 = vrot.lane.b32.xlu0 %v3415_v14, %s3316_s18 }
 0x6e5   :  { %762 = vrot.lane.b32.xlu0 %v3420_v15, %s3318_s20  ;;  %v767_v15 = vpop.permute.xlu1 %766 }
 0x6e9   :  { %v765_v55 = vpop.permute.xlu1 %764 }
 0x750   :  { %v670_v18 = vpop.xlane.xlu0 %669 }
 0x751   :  { %3200 = vrcp.f32 %v670_v18 }
 0x754   :  { %v667_v45 = vpop.xlane.xlu0 %666 }
 0x755   :  { %3202 = vrcp.f32 %v667_v45 }
 0x758   :  { %v676_v46 = vpop.permute.xlu0 %675 }
 0x759   :  { %2984 = vmatprep.subr.mxu1 %v676_v46 }
 0x75a   :  { %2985 = vmatpush3.msra.mxu1 %v676_v46 }
 0x75b   :  { %2989 = vmatprep.subr.msk.mxu1 %vm166_vm1, %v769_v47 }
 0x75c   :  { %v763_v54 = vpop.permute.xlu0 %762 }
 0x75e   :  { %v3201_v48 = vpop.eup %3200 }
 0x75f   :  { %v674_v53 = vmul.f32 %v3201_v48, %v3197_v41 }
 0x762   :  { %v3203_v51 = vpop.eup %3202 }
 0x763   :  { %v673_v52 = vmul.f32 %v3203_v51, %v3199_v43 }
 0x765   :  { %2986 = vmatprep.mubr.msk.f32.mxu1 %vm252_vm2, %v673_v52 }
 0x766   :  { %2987 = vmatmul.mubr.msk.f32.vlgmr.msra.gmra.mxu1 %vm252_vm2, %v674_v53 }
 0x767   :  { %2990 = vmatpush3.xpose.msk.msra.mxu1 %vm166_vm1, %v769_v47  ;;  %2993 = vmatprep.mubr.msk.f32.mxu1 %vm166_vm1, %v763_v54 }
 0x768   :  { %2991 = vmatprep.subr.msk.mxu1 %vm166_vm1, %v767_v15 }
 0x76b   :  { %2992 = vmatpush3.xpose.msk.msra.mxu1 %vm166_vm1, %v767_v15 }
 0x76e   :  { %2994 = vmatmul.mubr.msk.f32.vlgmr.msra.gmra.mxu1 %vm166_vm1, %v765_v55 }
 0x826   :  { %v2988_v56 = vpop.f32.mrf.mxu1 }
 0x828   :  { %v753_v57 = vpop.f32.mrf.mxu1 }
 0x82e   :  { %v2995_v58 = vpop.f32.mrf.mxu1 }
 0x82f   :  { %v850_v59 = vadd.f32 %v2995_v58, %v3443_v21 }
 0x830   :  { %v844_v60 = vpop.f32.mrf.mxu1 }
 0x831   :  { %v845_v61 = vadd.f32 %v844_v60, %v3438_v20  ;;  %v856_v62 = vsel %vm252_vm2, %v850_v59, -inf }
 0x832   :  { %857 = vmax.xlane.f32.xlu1 %v856_v62  ;;  %v61_v62 = vld [vmem:[%s3928_s4 + $0x10] sm:$0xff] }
 0x833   :  { %v853_v63 = vsel %vm252_vm2, %v845_v61, -inf }
 0x834   :  { %854 = vmax.xlane.f32.xlu0 %v853_v63  ;;  %v60_v63 = vld [vmem:[%s3928_s4 + $0x8] sm:$0xff] }
 0x843   :  { %877 = vrot.lane.b32.xlu1 %v3413_v12, %s3319_s21 }
 0x847   :  { %964 = vrot.lane.b32.xlu1 %v3503_v27, %s3308_s13 }
 0x84b   :  { %966 = vrot.lane.b32.xlu1 %v3501_v26, %s3308_s13 }
 0x84f   :  { %974 = vrot.lane.b32.xlu1 %v2988_v56, %s3320_s22 }
 0x8bb   :  { %v858_v0 = vpop.xlane.xlu1 %857 }
 0x8bc   :  { %v860_v1 = vsub.f32 %v850_v59, %v858_v0  ;;  %v59_v0 = vld [vmem:[%s3928_s4] sm:$0xff] }
 0x8bd   :  { %v855_v3 = vpop.xlane.xlu0 %854 }
 0x8be   :  { %v863_v4 = vmul.f32 1.442695, %v860_v1  ;;  %v859_v6 = vsub.f32 %v845_v61, %v855_v3  ;;  %v70_v1 = vld [vmem:[%s3929_s5 + $0x38] sm:$0xff]  ;;  %v69_v3 = vld [vmem:[%s3929_s5 + $0x30] sm:$0xff] }
 0x8bf   :  { %v878_v10 = vpop.permute.xlu1 %877 }
 0x8c0   :  { %3204 = vpow2.f32 %v863_v4  ;;  %v861_v11 = vmul.f32 1.442695, %v859_v6  ;;  %2996 = vmatprep.subr.mxu0 %v878_v10  ;;  %v68_v4 = vld [vmem:[%s3929_s5 + $0x28] sm:$0xff]  ;;  %v67_v6 = vld [vmem:[%s3929_s5 + $0x20] sm:$0xff] }
 0x8c1   :  { %2997 = vmatpush3.msra.mxu0 %v878_v10 }
 0x8c2   :  { %3206 = vpow2.f32 %v861_v11 }
 0x8c3   :  { %v965_v33 = vpop.permute.xlu1 %964 }
 0x8c4   :  { %v986_v37 = vsel %vm166_vm1, %v3473_v50, %v965_v33  ;;  %v995_v50 = vsub.s32 1, %v3405_v7  ;;  %v65_v33 = vld [vmem:[%s3929_s5 + $0x10] sm:$0xff] }
 0x8c6   :  { %v996_v18 = vrot.slane %v3408_v9, %v995_v50 }
 0x8c7   :  { %v967_v34 = vpop.permute.xlu1 %966 }
 0x8c8   :  { %v987_v39 = vsel %vm166_vm1, %v3471_v49, %v967_v34  ;;  %v64_v34 = vld [vmem:[%s3929_s5 + $0x8] sm:$0xff] }
 0x8cb   :  { %v975_v35 = vpop.permute.xlu1 %974 }
 0x8cc   :  { %v989_v42 = vsel %vm252_vm2, %v987_v39, %v975_v35  ;;  %v63_v35 = vld [vmem:[%s3929_s5] sm:$0xff] }
 0x8cd   :  { %v3205_v12 = vpop.eup %3204 }
 0x8ce   :  { %v868_v13 = vsel %vm252_vm2, %v3205_v12, 0.0 }
 0x8cf   :  { %v3207_v16 = vpop.eup %3206  ;;  %869 = vadd.xlane.f32.xlu0 %v868_v13 }
 0x8d0   :  { %v865_v17 = vsel %vm252_vm2, %v3207_v16, 0.0 }
 0x8d3   :  { %866 = vadd.xlane.f32.xlu0 %v865_v17 }
 0x8e9   :  { %875 = vrot.lane.b32.xlu0 %v3415_v14, %s3319_s21  ;;  %v58_v14 = vld [vmem:[%s3927_s3 + $0x18] sm:$0xff] }
 0x8ed   :  { %972 = vrot.lane.b32.xlu0 %v753_v57, %s3320_s22 }
 0x958   :  { %v870_v19 = vpop.xlane.xlu0 %869 }
 0x959   :  { %3208 = vrcp.f32 %v870_v19  ;;  %v1109_v19 = vsub.s32 4, %v3405_v7 }
 0x95c   :  { %v867_v22 = vpop.xlane.xlu0 %866 }
 0x95d   :  { %3210 = vrcp.f32 %v867_v22  ;;  %v1115_v22 = vsub.s32 5, %v3405_v7 }
 0x960   :  { %v876_v23 = vpop.permute.xlu0 %875 }
 0x961   :  { %2998 = vmatprep.subr.mxu0 %v876_v23 }
 0x962   :  { %2999 = vmatpush3.msra.mxu0 %v876_v23  ;;  %v1110_v23 = vrot.slane %v3408_v9, %v1109_v19 }
 0x963   :  { %3003 = vmatprep.subr.mxu0 %v58_v14 }
 0x964   :  { %v973_v36 = vpop.permute.xlu0 %972 }
 0x965   :  { %v988_v40 = vsel %vm252_vm2, %v986_v37, %v973_v36  ;;  %v1121_v36 = vsub.s32 2, %v3405_v7 }
 0x966   :  { %v3209_v24 = vpop.eup %3208 }
 0x967   :  { %v874_v27 = vmul.f32 %v3209_v24, %v3205_v12  ;;  %v1122_v37 = vrot.slane %v3408_v9, %v1121_v36 }
 0x96a   :  { %v3211_v25 = vpop.eup %3210 }
 0x96b   :  { %v873_v26 = vmul.f32 %v3211_v25, %v3207_v16 }
 0x96d   :  { %3000 = vmatprep.mubr.msk.f32.mxu0 %vm252_vm2, %v873_v26  ;;  %v1116_v26 = vrot.slane %v3408_v9, %v1115_v22 }
 0x96e   :  { %3001 = vmatmul.mubr.msk.f32.vlgmr.msra.gmra.mxu0 %vm252_vm2, %v874_v27 }
 0x96f   :  { %3004 = vmatpush3.msra.mxu0 %v58_v14 }
 0x970   :  { %3005 = vmatprep.subr.mxu0 %v57_v28 }
 0x971   :  { %3006 = vmatpush3.msra.mxu0 %v57_v28 }
 0x972   :  { %3007 = vmatprep.subr.mxu0 %v56_v29 }
 0x973   :  { %3008 = vmatpush3.msra.mxu0 %v56_v29 }
 0x974   :  { %3009 = vmatprep.subr.mxu0 %v55_v30 }
 0x975   :  { %3010 = vmatpush3.msra.mxu0 %v55_v30 }
 0x976   :  { %3025 = vmatprep.subr.mxu0 %v70_v1 }
 0xa2e   :  { %v3002_v31 = vpop.f32.mrf.mxu0 }
 0xa2f   :  { %982 = vrot.lane.b32.xlu1 %v3002_v31, %s3321_s30 }
 0xa30   :  { %v953_v32 = vpop.f32.mrf.mxu0 }
 0xa31   :  { %980 = vrot.lane.b32.xlu0 %v953_v32, %s3321_s30  ;;  %v66_v32 = vld [vmem:[%s3929_s5 + $0x18] sm:$0xff] }
 0xaa1   :  { %v983_v38 = vpop.permute.xlu1 %982 }
 0xaa2   :  { %v992_v44 = vsel %vm990_vm3, %v989_v42, %v983_v38 }
 0xaa3   :  { %v981_v41 = vpop.permute.xlu0 %980 }
 0xaa4   :  { %v991_v43 = vsel %vm990_vm3, %v988_v40, %v981_v41 }
 0xaa5   :  { %3011 = vmatprep.mubr.msk.f32.mxu0 %vm76_vm0, %v991_v43 }
 0xaa6   :  { %3012 = vmatmul.mubr.msk.f32.vlgmr.msra.gmra.mxu0 %vm76_vm0, %v992_v44  ;;  %v1208_v44 = vsub.s32 3, %v3405_v7 }
 0xaa7   :  { %3026 = vmatpush3.msra.mxu0 %v70_v1 }
 0xaa8   :  { %3027 = vmatprep.subr.mxu0 %v69_v3 }
 0xaa9   :  { %3028 = vmatpush3.msra.mxu0 %v69_v3 }
 0xaaa   :  { %3029 = vmatprep.subr.mxu0 %v68_v4 }
 0xaab   :  { %3030 = vmatpush3.msra.mxu0 %v68_v4 }
 0xaac   :  { %3031 = vmatprep.subr.mxu0 %v67_v6 }
 0xaad   :  { %3032 = vmatpush3.msra.mxu0 %v67_v6 }
 0xaae   :  { %3033 = vmatprep.subr.mxu0 %v66_v32 }
 0xaaf   :  { %3034 = vmatpush3.msra.mxu0 %v66_v32 }
 0xab0   :  { %3035 = vmatprep.subr.mxu0 %v65_v33 }
 0xab1   :  { %3036 = vmatpush3.msra.mxu0 %v65_v33 }
 0xab2   :  { %3037 = vmatprep.subr.mxu0 %v64_v34 }
 0xab3   :  { %3038 = vmatpush3.msra.mxu0 %v64_v34 }
 0xab4   :  { %3039 = vmatprep.subr.mxu0 %v63_v35 }
 0xab5   :  { %3040 = vmatpush3.msra.mxu0 %v63_v35 }
 0xb66   :  { %v3013_v49 = vpop.f32.mrf.mxu0 }
 0xb67   :  { %v1075_v45 = vadd.f32 %v3013_v49, %v996_v18 }
 0xb68   :  { %v1069_v46 = vpop.f32.mrf.mxu0 }
 0xb69   :  { %v1070_v47 = vadd.f32 %v1069_v46, %v996_v18  ;;  %v1079_v48 = vadd.f32 %v1075_v45, %v3401_v5  ;;  %v1209_v18 = vrot.slane %v3408_v9, %v1208_v44 }
 0xb6b   :  { %v1083_v51 = vsel %vm76_vm0, %v1079_v48, 0.0  ;;  %v1078_v52 = vadd.f32 %v1070_v47, %v3388_v2  ;;  %v62_v2 = vld [vmem:[%s3928_s4 + $0x18] sm:$0xff] }
 0xb6c   :  { %1084 = vadd.xlane.f32.xlu1 %v1083_v51  ;;  %3014 = vmatprep.subr.mxu1 %v62_v2 }
 0xb6d   :  { %v1080_v53 = vsel %vm76_vm0, %v1078_v52, 0.0  ;;  %3015 = vmatpush3.msra.mxu1 %v62_v2  ;;  %v2758_v2 = vld [vmem:[%s3926_s2 + $0x38] sm:$0xff] }
 0xb6e   :  { %1081 = vadd.xlane.f32.xlu0 %v1080_v53  ;;  %3016 = vmatprep.subr.mxu1 %v61_v62 }
 0xb6f   :  { %3017 = vmatpush3.msra.mxu1 %v61_v62  ;;  %v2757_v62 = vld [vmem:[%s3926_s2 + $0x30] sm:$0xff] }
 0xb70   :  { %3018 = vmatprep.subr.mxu1 %v60_v63 }
 0xb71   :  { %3019 = vmatpush3.msra.mxu1 %v60_v63  ;;  %v2756_v63 = vld [vmem:[%s3926_s2 + $0x28] sm:$0xff] }
 0xb72   :  { %3020 = vmatprep.subr.mxu1 %v59_v0 }
 0xb73   :  { %3021 = vmatpush3.msra.mxu1 %v59_v0  ;;  %v2755_v0 = vld [vmem:[%s3926_s2 + $0x20] sm:$0xff] }
 0xb74   :  { %3044 = vmatprep.subr.mxu1 %v2758_v2 }
 0xbf5   :  { %v1085_v54 = vpop.xlane.xlu1 %1084 }
 0xbf6   :  { %v1088_v15 = vmul.f32 0.03125, %v1085_v54 }
 0xbf7   :  { %v1082_v55 = vpop.xlane.xlu0 %1081 }
 0xbf8   :  { %v1087_v56 = vmul.f32 0.03125, %v1082_v55  ;;  %v1090_v57 = vsub.f32 %v1079_v48, %v1088_v15 }
 0xbfa   :  { %v1089_v58 = vsub.f32 %v1078_v52, %v1087_v56  ;;  %v1092_v61 = vmul.f32 %v1090_v57, %v1090_v57 }
 0xbfc   :  { %v1091_v59 = vmul.f32 %v1089_v58, %v1089_v58  ;;  %v1096_v5 = vsel %vm76_vm0, %v1092_v61, 0.0 }
 0xbfe   :  { %v1093_v60 = vsel %vm76_vm0, %v1091_v59, 0.0 }
 0xbff   :  { %1094 = vadd.xlane.f32.xlu0 %v1093_v60 }
 0xc03   :  { %1097 = vadd.xlane.f32.xlu0 %v1096_v5 }
 0xc88   :  { %v1095_v10 = vpop.xlane.xlu0 %1094 }
 0xc89   :  { %v1099_v11 = vmul.f32 0.03125, %v1095_v10 }
 0xc8b   :  { %v1101_v12 = vadd.f32 1e-05, %v1099_v11 }
 0xc8c   :  { %v1098_v13 = vpop.xlane.xlu0 %1097 }
 0xc8d   :  { %3212 = vrsqrt.f32 %v1101_v12  ;;  %v1100_v16 = vmul.f32 0.03125, %v1098_v13  ;;  %v1322_v12 = vsub.s32 6, %v3405_v7 }
 0xc8f   :  { %v1102_v17 = vadd.f32 1e-05, %v1100_v16  ;;  %v1323_v16 = vrot.slane %v3408_v9, %v1322_v12 }
 0xc91   :  { %3214 = vrsqrt.f32 %v1102_v17  ;;  %v1328_v17 = vsub.s32 7, %v3405_v7 }
 0xc9a   :  { %v3213_v24 = vpop.eup %3212 }
 0xc9b   :  { %v1105_v25 = vmul.f32 %v3213_v24, %v1089_v58 }
 0xc9d   :  { %v1111_v27 = vmul.f32 %v1110_v23, %v1105_v25 }
 0xc9e   :  { %v3215_v14 = vpop.eup %3214 }
 0xc9f   :  { %v1106_v28 = vmul.f32 %v3215_v14, %v1090_v57  ;;  %v1117_v29 = vadd.f32 %v1116_v26, %v1111_v27  ;;  %v1329_v27 = vrot.slane %v3408_v9, %v1328_v17 }
 0xca1   :  { %v1112_v30 = vmul.f32 %v1110_v23, %v1106_v28  ;;  %3022 = vmatprep.mubr.msk.f32.mxu1 %vm76_vm0, %v1117_v29 }
 0xca3   :  { %v1118_v31 = vadd.f32 %v1116_v26, %v1112_v30  ;;  %v3671_v30 = vld [vmem:[#allocation2 + $0x8] sm:$0xff] }
 0xca5   :  { %3023 = vmatmul.mubr.msk.f32.vlgmr.msra.gmra.mxu1 %vm76_vm0, %v1118_v31 }
 0xca6   :  { %3045 = vmatpush3.msra.mxu1 %v2758_v2 }
 0xca7   :  { %3046 = vmatprep.subr.mxu1 %v2757_v62 }
 0xca8   :  { %3047 = vmatpush3.msra.mxu1 %v2757_v62 }
 0xca9   :  { %3048 = vmatprep.subr.mxu1 %v2756_v63 }
 0xcaa   :  { %3049 = vmatpush3.msra.mxu1 %v2756_v63 }
 0xcab   :  { %3050 = vmatprep.subr.mxu1 %v2755_v0 }
 0xcac   :  { %3051 = vmatpush3.msra.mxu1 %v2755_v0 }
 0xd65   :  { %v3024_v38 = vpop.f32.mrf.mxu1 }
 0xd66   :  { %v1201_v39 = vadd.f32 %v3024_v38, %v1122_v37 }
 0xd67   :  { %v1195_v40 = vpop.f32.mrf.mxu1 }
 0xd68   :  { %v1196_v41 = vadd.f32 %v1195_v40, %v1122_v37  ;;  %v1205_v43 = vmax.f32 %v1201_v39, 0.0 }
 0xd6a   :  { %v1204_v42 = vmax.f32 %v1196_v41, 0.0 }
 0xd6c   :  { %3041 = vmatprep.mubr.msk.f32.mxu0 %vm1210_vm4, %v1204_v42 }
 0xd6d   :  { %3042 = vmatmul.mubr.msk.f32.vlgmr.msra.gmra.mxu0 %vm1210_vm4, %v1205_v43 }
 0xe2d   :  { %v3043_v49 = vpop.f32.mrf.mxu0 }
 0xe2e   :  { %v1289_v45 = vadd.f32 %v3043_v49, %v1209_v18 }
 0xe2f   :  { %v1283_v46 = vpop.f32.mrf.mxu0 }
 0xe30   :  { %v1284_v47 = vadd.f32 %v1283_v46, %v1209_v18  ;;  %v1293_v48 = vadd.f32 %v1289_v45, %v1118_v31  ;;  %v1361_v31 = vrot.slane %v3671_v30, %v74_v8 }
 0xe32   :  { %v1297_v51 = vsel %vm76_vm0, %v1293_v48, 0.0  ;;  %v1292_v52 = vadd.f32 %v1284_v47, %v1117_v29 }
 0xe33   :  { %1298 = vadd.xlane.f32.xlu0 %v1297_v51 }
 0xe34   :  { %v1294_v53 = vsel %vm76_vm0, %v1292_v52, 0.0 }
 0xe35   :  { %1295 = vadd.xlane.f32.xlu1 %v1294_v53 }
 0xebc   :  { %v1299_v54 = vpop.xlane.xlu0 %1298 }
 0xebd   :  { %v1301_v15 = vmul.f32 0.03125, %v1299_v54 }
 0xebe   :  { %v1296_v55 = vpop.xlane.xlu1 %1295 }
 0xebf   :  { %v1303_v56 = vsub.f32 %v1293_v48, %v1301_v15  ;;  %v1300_v57 = vmul.f32 0.03125, %v1296_v55 }
 0xec1   :  { %v1302_v58 = vsub.f32 %v1292_v52, %v1300_v57  ;;  %v1305_v59 = vmul.f32 %v1303_v56, %v1303_v56 }
 0xec3   :  { %v1309_v60 = vsel %vm76_vm0, %v1305_v59, 0.0  ;;  %v1304_v61 = vmul.f32 %v1302_v58, %v1302_v58 }
 0xec4   :  { %1310 = vadd.xlane.f32.xlu0 %v1309_v60 }
 0xec5   :  { %v1306_v5 = vsel %vm76_vm0, %v1304_v61, 0.0 }
 0xec6   :  { %1307 = vadd.xlane.f32.xlu1 %v1306_v5 }
 0xf4d   :  { %v1311_v1 = vpop.xlane.xlu0 %1310 }
 0xf4e   :  { %v1313_v3 = vmul.f32 0.03125, %v1311_v1 }
 0xf4f   :  { %v1308_v4 = vpop.xlane.xlu1 %1307 }
 0xf50   :  { %v1315_v6 = vadd.f32 1e-05, %v1313_v3  ;;  %v1312_v10 = vmul.f32 0.03125, %v1308_v4 }
 0xf52   :  { %3216 = vrsqrt.f32 %v1315_v6  ;;  %v1314_v11 = vadd.f32 1e-05, %v1312_v10 }
 0xf54   :  { %3218 = vrsqrt.f32 %v1314_v11 }
 0xf5f   :  { %v3217_v13 = vpop.eup %3216 }
 0xf60   :  { %v1319_v23 = vmul.f32 %v3217_v13, %v1303_v56 }
 0xf61   :  { %v3219_v24 = vpop.eup %3218 }
 0xf62   :  { %v1318_v25 = vmul.f32 %v3219_v24, %v1302_v58  ;;  %v1325_v26 = vmul.f32 %v1323_v16, %v1319_v23 }
 0xf64   :  { %v1324_v14 = vmul.f32 %v1323_v16, %v1318_v25  ;;  %v3665_v29 = vadd.f32 %v1329_v27, %v1325_v26 }
 0xf66   :  { %v3663_v28 = vadd.f32 %v1329_v27, %v1324_v14 }
 0xf68   :  { %3052 = vmatprep.mubr.msk.f32.mxu1 %vm76_vm0, %v3663_v28 }
 0xf69   :  { %3053 = vmatmul.mubr.msk.f32.vlgmr.msra.gmra.mxu1 %vm76_vm0, %v3665_v29 }
0x1029   :  { %v3054_v32 = vpop.f32.mrf.mxu1 }
0x102a   :  { %v3676_v33 = vadd.f32 %v3054_v32, %v1361_v31 }
0x102b   :  { %v1434_v9 = vpop.f32.mrf.mxu1 }
0x102c   :  { %v3678_v34 = vadd.f32 %v1434_v9, %v1361_v31  ;;  %1449 = vrot.lane.b32.xlu1 %v3676_v33, %s3309_s0  ;;  %v3696_v8 = vmul.f32 0.35355338, %v3676_v33 }
0x102e   :  { %1447 = vrot.lane.b32.xlu0 %v3678_v34, %s3309_s0  ;;  %v3685_v35 = vmul.f32 0.35355338, %v3678_v34 }
0x1030   :  { %1651 = vrot.lane.b32.xlu1 %v3676_v33, %s3312_s14  ;;  %3059 = vmatprep.mubr.msk.f32.mxu1 %vm166_vm1, %v3685_v35 }
0x1032   :  { %1645 = vrot.lane.b32.xlu0 %v3685_v35, %s3311_s11 }
0x1034   :  { %1649 = vrot.lane.b32.xlu1 %v3678_v34, %s3312_s14 }
0x1038   :  { %1647 = vrot.lane.b32.xlu1 %v3696_v8, %s3311_s11 }
0x109e   :  { %v1450_v37 = vpop.permute.xlu1 %1449 }
0x109f   :  { %3055 = vmatprep.subr.msk.mxu1 %vm166_vm1, %v1450_v37 }
0x10a0   :  { %3056 = vmatpush3.xpose.msk.msra.mxu1 %vm166_vm1, %v1450_v37  ;;  %v1448_v38 = vpop.permute.xlu0 %1447 }
0x10a1   :  { %3057 = vmatprep.subr.msk.mxu1 %vm166_vm1, %v1448_v38 }
0x10a2   :  { %v1652_v39 = vpop.permute.xlu1 %1651 }
0x10a4   :  { %3058 = vmatpush3.xpose.msk.msra.mxu1 %vm166_vm1, %v1448_v38  ;;  %v1646_v40 = vpop.permute.xlu0 %1645 }
0x10a5   :  { %3069 = vmatprep.subr.msk.mxu1 %vm166_vm1, %v1652_v39 }
0x10a6   :  { %v1650_v41 = vpop.permute.xlu1 %1649 }
0x10a7   :  { %3060 = vmatmul.mubr.msk.f32.vlgmr.msra.gmra.mxu1 %vm166_vm1, %v3696_v8 }
0x10a8   :  { %3070 = vmatpush3.xpose.msk.msra.mxu1 %vm166_vm1, %v1652_v39  ;;  %3073 = vmatprep.mubr.msk.f32.mxu1 %vm166_vm1, %v1646_v40 }
0x10a9   :  { %3071 = vmatprep.subr.msk.mxu1 %vm166_vm1, %v1650_v41 }
0x10aa   :  { %v1648_v42 = vpop.permute.xlu1 %1647 }
0x10ac   :  { %3072 = vmatpush3.xpose.msk.msra.mxu1 %vm166_vm1, %v1650_v41 }
0x10af   :  { %3074 = vmatmul.mubr.msk.f32.vlgmr.msra.gmra.mxu1 %vm166_vm1, %v1648_v42 }
0x1167   :  { %v3061_v43 = vpop.f32.mrf.mxu1 }
0x1168   :  { %v1533_v18 = vadd.f32 %v3061_v43, %v3443_v21 }
0x1169   :  { %v1527_v49 = vpop.f32.mrf.mxu1 }
0x116a   :  { %v1528_v45 = vadd.f32 %v1527_v49, %v3438_v20  ;;  %v1539_v46 = vsel %vm252_vm2, %v1533_v18, -inf }
0x116b   :  { %1540 = vmax.xlane.f32.xlu1 %v1539_v46 }
0x116c   :  { %v1536_v47 = vsel %vm252_vm2, %v1528_v45, -inf }
0x116d   :  { %1537 = vmax.xlane.f32.xlu0 %v1536_v47 }
0x116f   :  { %v3075_v48 = vpop.f32.mrf.mxu1 }
0x1170   :  { %v1733_v53 = vadd.f32 %v3075_v48, %v3443_v21 }
0x1171   :  { %v1727_v51 = vpop.f32.mrf.mxu1 }
0x1172   :  { %v1728_v52 = vadd.f32 %v1727_v51, %v3438_v20  ;;  %v1739_v15 = vsel %vm252_vm2, %v1733_v53, -inf }
0x1174   :  { %v1736_v54 = vsel %vm252_vm2, %v1728_v52, -inf }
0x1175   :  { %1737 = vmax.xlane.f32.xlu0 %v1736_v54 }
0x1179   :  { %1740 = vmax.xlane.f32.xlu0 %v1739_v15  ;;  %v3261_v15 = vld [vmem:[%s3925_s1] sm:$0xff] }
0x117c   :  { %1560 = vrot.lane.b32.xlu1 %v3676_v33, %s3310_s10 }
0x1180   :  { %1760 = vrot.lane.b32.xlu1 %v3676_v33, %s3313_s15 }
0x1184   :  { %1758 = vrot.lane.b32.xlu1 %v3678_v34, %s3313_s15 }
0x118f   :  { %1558 = vrot.lane.b32.xlu0 %v3678_v34, %s3310_s10 }
0x11f4   :  { %v1541_v20 = vpop.xlane.xlu1 %1540 }
0x11f5   :  { %v1543_v21 = vsub.f32 %v1533_v18, %v1541_v20 }
0x11f6   :  { %v1538_v55 = vpop.xlane.xlu0 %1537 }
0x11f7   :  { %v1546_v56 = vmul.f32 1.442695, %v1543_v21  ;;  %v1542_v57 = vsub.f32 %v1528_v45, %v1538_v55 }
0x11f8   :  { %v1561_v58 = vpop.permute.xlu1 %1560 }
0x11f9   :  { %3220 = vpow2.f32 %v1546_v56  ;;  %v1544_v59 = vmul.f32 1.442695, %v1542_v57  ;;  %3062 = vmatprep.subr.mxu0 %v1561_v58 }
0x11fa   :  { %3063 = vmatpush3.msra.mxu0 %v1561_v58 }
0x11fb   :  { %3222 = vpow2.f32 %v1544_v59 }
0x11fc   :  { %v1761_v3 = vpop.permute.xlu1 %1760 }
0x11fe   :  { %v1738_v60 = vpop.xlane.xlu0 %1737 }
0x11ff   :  { %v1742_v11 = vsub.f32 %v1728_v52, %v1738_v60  ;;  %v3260_v52 = vld [vmem:[%s3925_s1 + $0x8] sm:$0xff] }
0x1200   :  { %v1759_v24 = vpop.permute.xlu1 %1758 }
0x1201   :  { %v1744_v13 = vmul.f32 1.442695, %v1742_v11 }
0x1202   :  { %v1741_v61 = vpop.xlane.xlu0 %1740 }
0x1203   :  { %v1743_v5 = vsub.f32 %v1733_v53, %v1741_v61 }
0x1205   :  { %v1746_v2 = vmul.f32 1.442695, %v1743_v5 }
0x1206   :  { %v3221_v62 = vpop.eup %3220  ;;  %v1559_v63 = vpop.permute.xlu0 %1558 }
0x1207   :  { %3224 = vpow2.f32 %v1746_v2  ;;  %3064 = vmatprep.subr.mxu0 %v1559_v63  ;;  %v1551_v0 = vsel %vm252_vm2, %v3221_v62, 0.0 }
0x1208   :  { %v3223_v1 = vpop.eup %3222  ;;  %1552 = vadd.xlane.f32.xlu0 %v1551_v0  ;;  %3065 = vmatpush3.msra.mxu0 %v1559_v63  ;;  %3226 = vpow2.f32 %v1744_v13 }
0x1209   :  { %3076 = vmatprep.subr.mxu0 %v1761_v3  ;;  %v1548_v4 = vsel %vm252_vm2, %v3223_v1, 0.0 }
0x120a   :  { %1549 = vadd.xlane.f32.xlu1 %v1548_v4 }
0x1214   :  { %v3225_v6 = vpop.eup %3224 }
0x1215   :  { %v1751_v10 = vsel %vm252_vm2, %v3225_v6, 0.0  ;;  %v3227_v16 = vpop.eup %3226 }
0x1216   :  { %1752 = vadd.xlane.f32.xlu0 %v1751_v10  ;;  %v1748_v23 = vsel %vm252_vm2, %v3227_v16, 0.0 }
0x121b   :  { %1849 = vrot.lane.b32.xlu1 %v3678_v34, %s3314_s16 }
0x122c   :  { %1851 = vrot.lane.b32.xlu0 %v3676_v33, %s3314_s16 }
0x1230   :  { %1845 = vrot.lane.b32.xlu0 %v3685_v35, %s3315_s17 }
0x123f   :  { %1749 = vadd.xlane.f32.xlu1 %v1748_v23 }
0x1250   :  { %1847 = vrot.lane.b32.xlu1 %v3696_v8, %s3315_s17 }
0x1291   :  { %v1553_v25 = vpop.xlane.xlu0 %1552 }
0x1292   :  { %3228 = vrcp.f32 %v1553_v25 }
0x1293   :  { %v1550_v26 = vpop.xlane.xlu1 %1549 }
0x1294   :  { %3230 = vrcp.f32 %v1550_v26 }
0x1297   :  { %v1850_v38 = vpop.permute.xlu1 %1849 }
0x129f   :  { %v3229_v27 = vpop.eup %3228  ;;  %v1753_v31 = vpop.xlane.xlu0 %1752 }
0x12a0   :  { %v1557_v9 = vmul.f32 %v3229_v27, %v3221_v62  ;;  %3232 = vrcp.f32 %v1753_v31 }
0x12a1   :  { %v3231_v14 = vpop.eup %3230 }
0x12a2   :  { %v1556_v32 = vmul.f32 %v3231_v14, %v3223_v1 }
0x12a3   :  { %v1852_v37 = vpop.permute.xlu0 %1851 }
0x12a4   :  { %3066 = vmatprep.mubr.msk.f32.mxu0 %vm252_vm2, %v1556_v32 }
0x12a5   :  { %3067 = vmatmul.mubr.msk.f32.vlgmr.msra.gmra.mxu0 %vm252_vm2, %v1557_v9 }
0x12a6   :  { %3077 = vmatpush3.msra.mxu0 %v1761_v3 }
0x12a7   :  { %3078 = vmatprep.subr.mxu0 %v1759_v24  ;;  %v1846_v18 = vpop.permute.xlu0 %1845 }
0x12a8   :  { %3079 = vmatpush3.msra.mxu0 %v1759_v24 }
0x12a9   :  { %3083 = vmatprep.subr.msk.mxu0 %vm166_vm1, %v1852_v37 }
0x12ad   :  { %v3233_v40 = vpop.eup %3232 }
0x12ae   :  { %v1757_v43 = vmul.f32 %v3233_v40, %v3225_v6 }
0x12c8   :  { %v1750_v39 = vpop.xlane.xlu1 %1749 }
0x12c9   :  { %3234 = vrcp.f32 %v1750_v39 }
0x12cc   :  { %v1848_v49 = vpop.permute.xlu1 %1847 }
0x12d6   :  { %v3235_v41 = vpop.eup %3234 }
0x12d7   :  { %v1756_v42 = vmul.f32 %v3235_v41, %v3227_v16 }
0x12d9   :  { %3080 = vmatprep.mubr.msk.f32.mxu0 %vm252_vm2, %v1756_v42 }
0x12da   :  { %3081 = vmatmul.mubr.msk.f32.vlgmr.msra.gmra.mxu0 %vm252_vm2, %v1757_v43 }
0x12db   :  { %3084 = vmatpush3.xpose.msk.msra.mxu0 %vm166_vm1, %v1852_v37  ;;  %3087 = vmatprep.mubr.msk.f32.mxu0 %vm166_vm1, %v1846_v18 }
0x12dc   :  { %3085 = vmatprep.subr.msk.mxu0 %vm166_vm1, %v1850_v38 }
0x12df   :  { %3086 = vmatpush3.xpose.msk.msra.mxu0 %vm166_vm1, %v1850_v38 }
0x12e2   :  { %3088 = vmatmul.mubr.msk.f32.vlgmr.msra.gmra.mxu0 %vm166_vm1, %v1848_v49 }
0x1365   :  { %v3750_v45 = vpop.f32.mrf.mxu0 }
0x1367   :  { %v3752_v46 = vpop.f32.mrf.mxu0 }
0x139a   :  { %v3754_v47 = vpop.f32.mrf.mxu0 }
0x139c   :  { %v3756_v48 = vpop.f32.mrf.mxu0 }
0x13a2   :  { %v3089_v51 = vpop.f32.mrf.mxu0 }
0x13a3   :  { %v1933_v53 = vadd.f32 %v3260_v52, %v3089_v51 }
0x13a4   :  { %v1927_v54 = vpop.f32.mrf.mxu0 }
0x13a5   :  { %v1928_v20 = vadd.f32 %v3261_v15, %v1927_v54  ;;  %v1939_v21 = vsel %vm252_vm2, %v1933_v53, -inf }
0x13a6   :  { %1940 = vmax.xlane.f32.xlu1 %v1939_v21  ;;  %v2761_v21 = vld [vmem:[%s3927_s3 + $0x30] sm:$0xff] }
0x13a7   :  { %v1936_v55 = vsel %vm252_vm2, %v1928_v20, -inf }
0x13a8   :  { %1937 = vmax.xlane.f32.xlu0 %v1936_v55  ;;  %v2760_v55 = vld [vmem:[%s3927_s3 + $0x28] sm:$0xff] }
0x13b7   :  { %1960 = vrot.lane.b32.xlu1 %v3676_v33, %s3316_s18 }
0x13bb   :  { %2051 = vrot.lane.b32.xlu1 %v3676_v33, %s3317_s19 }
0x13bf   :  { %2049 = vrot.lane.b32.xlu1 %v3678_v34, %s3317_s19 }
0x13c3   :  { %2047 = vrot.lane.b32.xlu1 %v3696_v8, %s3318_s20 }
0x142f   :  { %v1941_v56 = vpop.xlane.xlu1 %1940 }
0x1430   :  { %v1943_v57 = vsub.f32 %v1933_v53, %v1941_v56  ;;  %v2759_v56 = vld [vmem:[%s3927_s3 + $0x20] sm:$0xff] }
0x1431   :  { %v1938_v58 = vpop.xlane.xlu0 %1937 }
0x1432   :  { %v1946_v59 = vmul.f32 1.442695, %v1943_v57  ;;  %v1942_v60 = vsub.f32 %v1928_v20, %v1938_v58 }
0x1433   :  { %v1961_v61 = vpop.permute.xlu1 %1960 }
0x1434   :  { %3236 = vpow2.f32 %v1946_v59  ;;  %v1944_v5 = vmul.f32 1.442695, %v1942_v60  ;;  %3090 = vmatprep.subr.mxu1 %v1961_v61 }
0x1435   :  { %3091 = vmatpush3.msra.mxu1 %v1961_v61 }
0x1436   :  { %3238 = vpow2.f32 %v1944_v5 }
0x1437   :  { %v2052_v4 = vpop.permute.xlu1 %2051 }
0x1441   :  { %v3237_v2 = vpop.eup %3236 }
0x1442   :  { %v1951_v62 = vsel %vm252_vm2, %v3237_v2, 0.0 }
0x1443   :  { %v3239_v63 = vpop.eup %3238  ;;  %1952 = vadd.xlane.f32.xlu0 %v1951_v62 }
0x1444   :  { %v1948_v0 = vsel %vm252_vm2, %v3239_v63, 0.0 }
0x1447   :  { %1949 = vadd.xlane.f32.xlu0 %v1948_v0 }
0x145d   :  { %1958 = vrot.lane.b32.xlu0 %v3678_v34, %s3316_s18 }
0x1461   :  { %2045 = vrot.lane.b32.xlu0 %v3685_v35, %s3318_s20  ;;  %v2050_v35 = vpop.permute.xlu1 %2049 }
0x1465   :  { %v2048_v23 = vpop.permute.xlu1 %2047 }
0x14cc   :  { %v1953_v8 = vpop.xlane.xlu0 %1952 }
0x14cd   :  { %3240 = vrcp.f32 %v1953_v8 }
0x14d0   :  { %v1950_v1 = vpop.xlane.xlu0 %1949 }
0x14d1   :  { %3242 = vrcp.f32 %v1950_v1 }
0x14d4   :  { %v1959_v3 = vpop.permute.xlu0 %1958 }
0x14d5   :  { %3092 = vmatprep.subr.mxu1 %v1959_v3 }
0x14d6   :  { %3093 = vmatpush3.msra.mxu1 %v1959_v3 }
0x14d7   :  { %3097 = vmatprep.subr.msk.mxu1 %vm166_vm1, %v2052_v4 }
0x14d8   :  { %v2046_v16 = vpop.permute.xlu0 %2045 }
0x14da   :  { %v3241_v6 = vpop.eup %3240 }
0x14db   :  { %v1957_v13 = vmul.f32 %v3241_v6, %v3237_v2 }
0x14de   :  { %v3243_v10 = vpop.eup %3242 }
0x14df   :  { %v1956_v11 = vmul.f32 %v3243_v10, %v3239_v63 }
0x14e1   :  { %3094 = vmatprep.mubr.msk.f32.mxu1 %vm252_vm2, %v1956_v11 }
0x14e2   :  { %3095 = vmatmul.mubr.msk.f32.vlgmr.msra.gmra.mxu1 %vm252_vm2, %v1957_v13 }
0x14e3   :  { %3098 = vmatpush3.xpose.msk.msra.mxu1 %vm166_vm1, %v2052_v4  ;;  %3101 = vmatprep.mubr.msk.f32.mxu1 %vm166_vm1, %v2046_v16 }
0x14e4   :  { %3099 = vmatprep.subr.msk.mxu1 %vm166_vm1, %v2050_v35 }
0x14e7   :  { %3100 = vmatpush3.xpose.msk.msra.mxu1 %vm166_vm1, %v2050_v35 }
0x14ea   :  { %3102 = vmatmul.mubr.msk.f32.vlgmr.msra.gmra.mxu1 %vm166_vm1, %v2048_v23 }
0x15a2   :  { %v3096_v24 = vpop.f32.mrf.mxu1 }
0x15a4   :  { %v2036_v25 = vpop.f32.mrf.mxu1 }
0x15aa   :  { %v3103_v26 = vpop.f32.mrf.mxu1 }
0x15ab   :  { %v2133_v27 = vadd.f32 %v3260_v52, %v3103_v26 }
0x15ac   :  { %v2127_v14 = vpop.f32.mrf.mxu1 }
0x15ad   :  { %v2128_v31 = vadd.f32 %v3261_v15, %v2127_v14  ;;  %v2139_v32 = vsel %vm252_vm2, %v2133_v27, -inf }
0x15ae   :  { %2140 = vmax.xlane.f32.xlu1 %v2139_v32 }
0x15af   :  { %v2136_v9 = vsel %vm252_vm2, %v2128_v31, -inf }
0x15b0   :  { %2137 = vmax.xlane.f32.xlu0 %v2136_v9 }
0x15bf   :  { %2160 = vrot.lane.b32.xlu1 %v3676_v33, %s3319_s21 }
0x15c3   :  { %2247 = vrot.lane.b32.xlu1 %v3756_v48, %s3308_s13 }
0x15c7   :  { %2249 = vrot.lane.b32.xlu1 %v3754_v47, %s3308_s13 }
0x15cb   :  { %2257 = vrot.lane.b32.xlu1 %v3096_v24, %s3320_s22 }
0x1637   :  { %v2141_v37 = vpop.xlane.xlu1 %2140 }
0x1638   :  { %v2143_v38 = vsub.f32 %v2133_v27, %v2141_v37  ;;  %v2765_v37 = vld [vmem:[%s3928_s4 + $0x30] sm:$0xff] }
0x1639   :  { %v2138_v39 = vpop.xlane.xlu0 %2137 }
0x163a   :  { %v2146_v40 = vmul.f32 1.442695, %v2143_v38  ;;  %v2142_v41 = vsub.f32 %v2128_v31, %v2138_v39  ;;  %v2764_v38 = vld [vmem:[%s3928_s4 + $0x28] sm:$0xff]  ;;  %v2763_v39 = vld [vmem:[%s3928_s4 + $0x20] sm:$0xff] }
0x163b   :  { %v2161_v42 = vpop.permute.xlu1 %2160 }
0x163c   :  { %3244 = vpow2.f32 %v2146_v40  ;;  %v2144_v43 = vmul.f32 1.442695, %v2142_v41  ;;  %3104 = vmatprep.subr.mxu0 %v2161_v42  ;;  %v2774_v40 = vld [vmem:[%s3929_s5 + $0x78] sm:$0xff]  ;;  %v2773_v41 = vld [vmem:[%s3929_s5 + $0x70] sm:$0xff] }
0x163d   :  { %3105 = vmatpush3.msra.mxu0 %v2161_v42  ;;  %v2772_v42 = vld [vmem:[%s3929_s5 + $0x68] sm:$0xff] }
0x163e   :  { %3246 = vpow2.f32 %v2144_v43  ;;  %v2771_v43 = vld [vmem:[%s3929_s5 + $0x60] sm:$0xff] }
0x163f   :  { %v2248_v59 = vpop.permute.xlu1 %2247 }
0x1640   :  { %v2269_v2 = vsel %vm166_vm1, %v3752_v46, %v2248_v59  ;;  %v2278_v46 = vrot.slane %v3671_v30, %v995_v50  ;;  %v2767_v59 = vld [vmem:[%s3929_s5 + $0x40] sm:$0xff] }
0x1643   :  { %v2250_v60 = vpop.permute.xlu1 %2249 }
0x1644   :  { %v2270_v63 = vsel %vm166_vm1, %v3750_v45, %v2250_v60  ;;  %v2403_v60 = vrot.slane %v3671_v30, %v1121_v36 }
0x1647   :  { %v2258_v61 = vpop.permute.xlu1 %2257 }
0x1648   :  { %v2272_v1 = vsel %vm252_vm2, %v2270_v63, %v2258_v61 }
0x1649   :  { %v3245_v33 = vpop.eup %3244 }
0x164a   :  { %v2151_v18 = vsel %vm252_vm2, %v3245_v33, 0.0 }
0x164b   :  { %v3247_v49 = vpop.eup %3246  ;;  %2152 = vadd.xlane.f32.xlu0 %v2151_v18 }
0x164c   :  { %v2148_v47 = vsel %vm252_vm2, %v3247_v49, 0.0 }
0x164f   :  { %2149 = vadd.xlane.f32.xlu0 %v2148_v47 }
0x1665   :  { %2158 = vrot.lane.b32.xlu0 %v3678_v34, %s3319_s21  ;;  %v2762_v34 = vld [vmem:[%s3927_s3 + $0x38] sm:$0xff] }
0x1669   :  { %2255 = vrot.lane.b32.xlu0 %v2036_v25, %s3320_s22 }
0x16d4   :  { %v2153_v48 = vpop.xlane.xlu0 %2152 }
0x16d5   :  { %3248 = vrcp.f32 %v2153_v48 }
0x16d8   :  { %v2150_v51 = vpop.xlane.xlu0 %2149 }
0x16d9   :  { %3250 = vrcp.f32 %v2150_v51 }
0x16dc   :  { %v2159_v52 = vpop.permute.xlu0 %2158 }
0x16dd   :  { %3106 = vmatprep.subr.mxu0 %v2159_v52 }
0x16de   :  { %3107 = vmatpush3.msra.mxu0 %v2159_v52  ;;  %v2391_v52 = vrot.slane %v3671_v30, %v1109_v19  ;;  %v2770_v19 = vld [vmem:[%s3929_s5 + $0x58] sm:$0xff] }
0x16df   :  { %3111 = vmatprep.subr.mxu0 %v2762_v34 }
0x16e0   :  { %v2256_v5 = vpop.permute.xlu0 %2255 }
0x16e1   :  { %v2271_v0 = vsel %vm252_vm2, %v2269_v2, %v2256_v5 }
0x16e2   :  { %v3249_v53 = vpop.eup %3248 }
0x16e3   :  { %v2157_v20 = vmul.f32 %v3249_v53, %v3245_v33 }
0x16e6   :  { %v3251_v54 = vpop.eup %3250 }
0x16e7   :  { %v2156_v15 = vmul.f32 %v3251_v54, %v3247_v49 }
0x16e9   :  { %3108 = vmatprep.mubr.msk.f32.mxu0 %vm252_vm2, %v2156_v15  ;;  %v2397_v15 = vrot.slane %v3671_v30, %v1115_v22  ;;  %v2769_v22 = vld [vmem:[%s3929_s5 + $0x50] sm:$0xff] }
0x16ea   :  { %3109 = vmatmul.mubr.msk.f32.vlgmr.msra.gmra.mxu0 %vm252_vm2, %v2157_v20 }
0x16eb   :  { %3112 = vmatpush3.msra.mxu0 %v2762_v34 }
0x16ec   :  { %3113 = vmatprep.subr.mxu0 %v2761_v21 }
0x16ed   :  { %3114 = vmatpush3.msra.mxu0 %v2761_v21 }
0x16ee   :  { %3115 = vmatprep.subr.mxu0 %v2760_v55 }
0x16ef   :  { %3116 = vmatpush3.msra.mxu0 %v2760_v55 }
0x16f0   :  { %3117 = vmatprep.subr.mxu0 %v2759_v56 }
0x16f1   :  { %3118 = vmatpush3.msra.mxu0 %v2759_v56 }
0x16f2   :  { %3133 = vmatprep.subr.mxu0 %v2774_v40 }
0x17aa   :  { %v3110_v57 = vpop.f32.mrf.mxu0 }
0x17ab   :  { %2265 = vrot.lane.b32.xlu1 %v3110_v57, %s3321_s30 }
0x17ac   :  { %v2236_v58 = vpop.f32.mrf.mxu0 }
0x17ad   :  { %2263 = vrot.lane.b32.xlu0 %v2236_v58, %s3321_s30  ;;  %v2768_v58 = vld [vmem:[%s3929_s5 + $0x48] sm:$0xff] }
0x181d   :  { %v2266_v62 = vpop.permute.xlu1 %2265 }
0x181e   :  { %v2274_v4 = vsel %vm990_vm3, %v2272_v1, %v2266_v62 }
0x181f   :  { %v2264_v8 = vpop.permute.xlu0 %2263 }
0x1820   :  { %v2273_v3 = vsel %vm990_vm3, %v2271_v0, %v2264_v8  ;;  %v2490_v8 = vrot.slane %v3671_v30, %v1208_v44 }
0x1821   :  { %3119 = vmatprep.mubr.msk.f32.mxu0 %vm76_vm0, %v2273_v3 }
0x1822   :  { %3120 = vmatmul.mubr.msk.f32.vlgmr.msra.gmra.mxu0 %vm76_vm0, %v2274_v4 }
0x1823   :  { %3134 = vmatpush3.msra.mxu0 %v2774_v40 }
0x1824   :  { %3135 = vmatprep.subr.mxu0 %v2773_v41 }
0x1825   :  { %3136 = vmatpush3.msra.mxu0 %v2773_v41  ;;  %v2603_v41 = vrot.slane %v3671_v30, %v1322_v12 }
0x1826   :  { %3137 = vmatprep.subr.mxu0 %v2772_v42 }
0x1827   :  { %3138 = vmatpush3.msra.mxu0 %v2772_v42 }
0x1828   :  { %3139 = vmatprep.subr.mxu0 %v2771_v43 }
0x1829   :  { %3140 = vmatpush3.msra.mxu0 %v2771_v43 }
0x182a   :  { %3141 = vmatprep.subr.mxu0 %v2770_v19 }
0x182b   :  { %3142 = vmatpush3.msra.mxu0 %v2770_v19 }
0x182c   :  { %3143 = vmatprep.subr.mxu0 %v2769_v22 }
0x182d   :  { %3144 = vmatpush3.msra.mxu0 %v2769_v22 }
0x182e   :  { %3145 = vmatprep.subr.mxu0 %v2768_v58 }
0x182f   :  { %3146 = vmatpush3.msra.mxu0 %v2768_v58 }
0x1830   :  { %3147 = vmatprep.subr.mxu0 %v2767_v59 }
0x1831   :  { %3148 = vmatpush3.msra.mxu0 %v2767_v59 }
0x18e2   :  { %v3121_v6 = vpop.f32.mrf.mxu0 }
0x18e3   :  { %v2357_v10 = vadd.f32 %v3121_v6, %v2278_v46 }
0x18e4   :  { %v2351_v45 = vpop.f32.mrf.mxu0 }
0x18e5   :  { %v2361_v11 = vadd.f32 %v2357_v10, %v3665_v29  ;;  %v2352_v13 = vadd.f32 %v2351_v45, %v2278_v46 }
0x18e7   :  { %v2365_v16 = vsel %vm76_vm0, %v2361_v11, 0.0  ;;  %v2360_v35 = vadd.f32 %v2352_v13, %v3663_v28  ;;  %v2766_v28 = vld [vmem:[%s3928_s4 + $0x38] sm:$0xff] }
0x18e8   :  { %2366 = vadd.xlane.f32.xlu1 %v2365_v16  ;;  %3122 = vmatprep.subr.mxu1 %v2766_v28 }
0x18e9   :  { %v2362_v23 = vsel %vm76_vm0, %v2360_v35, 0.0  ;;  %3123 = vmatpush3.msra.mxu1 %v2766_v28 }
0x18ea   :  { %2363 = vadd.xlane.f32.xlu0 %v2362_v23  ;;  %3124 = vmatprep.subr.mxu1 %v2765_v37 }
0x18eb   :  { %3125 = vmatpush3.msra.mxu1 %v2765_v37 }
0x18ec   :  { %3126 = vmatprep.subr.mxu1 %v2764_v38 }
0x18ed   :  { %3127 = vmatpush3.msra.mxu1 %v2764_v38 }
0x18ee   :  { %3128 = vmatprep.subr.mxu1 %v2763_v39 }
0x18ef   :  { %3129 = vmatpush3.msra.mxu1 %v2763_v39 }
0x1971   :  { %v2367_v24 = vpop.xlane.xlu1 %2366 }
0x1972   :  { %v2369_v25 = vmul.f32 0.03125, %v2367_v24 }
0x1973   :  { %v2364_v26 = vpop.xlane.xlu0 %2363 }
0x1974   :  { %v2368_v27 = vmul.f32 0.03125, %v2364_v26  ;;  %v2371_v14 = vsub.f32 %v2361_v11, %v2369_v25 }
0x1976   :  { %v2370_v50 = vsub.f32 %v2360_v35, %v2368_v27  ;;  %v2373_v9 = vmul.f32 %v2371_v14, %v2371_v14 }
0x1978   :  { %v2372_v31 = vmul.f32 %v2370_v50, %v2370_v50  ;;  %v2377_v29 = vsel %vm76_vm0, %v2373_v9, 0.0 }
0x197a   :  { %v2374_v32 = vsel %vm76_vm0, %v2372_v31, 0.0  ;;  %v2613_v31 = vld [vmem:[%s3931_s7 + $0x8] sm:$0xff] }
0x197b   :  { %2375 = vadd.xlane.f32.xlu0 %v2374_v32  ;;  %v2612_v32 = vld [vmem:[%s3931_s7] sm:$0xff] }
0x197f   :  { %2378 = vadd.xlane.f32.xlu0 %v2377_v29 }
0x1a04   :  { %v2376_v33 = vpop.xlane.xlu0 %2375 }
0x1a05   :  { %v2380_v18 = vmul.f32 0.03125, %v2376_v33 }
0x1a07   :  { %v2382_v49 = vadd.f32 1e-05, %v2380_v18 }
0x1a08   :  { %v2379_v47 = vpop.xlane.xlu0 %2378 }
0x1a09   :  { %3252 = vrsqrt.f32 %v2382_v49  ;;  %v2381_v48 = vmul.f32 0.03125, %v2379_v47  ;;  %v2609_v49 = vrot.slane %v3671_v30, %v1328_v17 }
0x1a0b   :  { %v2383_v51 = vadd.f32 1e-05, %v2381_v48 }
0x1a0d   :  { %3254 = vrsqrt.f32 %v2383_v51 }
0x1a16   :  { %v3253_v53 = vpop.eup %3252 }
0x1a17   :  { %v2386_v54 = vmul.f32 %v3253_v53, %v2370_v50  ;;  %v2614_v50 = vld [vmem:[%s3931_s7 + $0x10] sm:$0xff] }
0x1a19   :  { %v2392_v20 = vmul.f32 %v2391_v52, %v2386_v54 }
0x1a1a   :  { %v3255_v34 = vpop.eup %3254 }
0x1a1b   :  { %v2387_v21 = vmul.f32 %v3255_v34, %v2371_v14  ;;  %v2398_v55 = vadd.f32 %v2397_v15, %v2392_v20  ;;  %v2615_v14 = vld [vmem:[%s3931_s7 + $0x18] sm:$0xff] }
0x1a1c   :  { %3152 = vmatprep.subr.mxu1 %v2615_v14 }
0x1a1d   :  { %v2393_v56 = vmul.f32 %v2391_v52, %v2387_v21  ;;  %3130 = vmatprep.mubr.msk.f32.mxu1 %vm76_vm0, %v2398_v55  ;;  %v2807_v52 = vld [vmem:[%s3932_s8] ss:$0 sm:$0xff] }
0x1a1f   :  { %v2399_v57 = vadd.f32 %v2397_v15, %v2393_v56 }
0x1a21   :  { %3131 = vmatmul.mubr.msk.f32.vlgmr.msra.gmra.mxu1 %vm76_vm0, %v2399_v57 }
0x1a22   :  { %3153 = vmatpush3.msra.mxu1 %v2615_v14 }
0x1a23   :  { %3154 = vmatprep.subr.mxu1 %v2614_v50 }
0x1a24   :  { %3155 = vmatpush3.msra.mxu1 %v2614_v50 }
0x1a25   :  { %3156 = vmatprep.subr.mxu1 %v2613_v31 }
0x1a26   :  { %3157 = vmatpush3.msra.mxu1 %v2613_v31 }
0x1a27   :  { %3158 = vmatprep.subr.mxu1 %v2612_v32 }
0x1a28   :  { %3159 = vmatpush3.msra.mxu1 %v2612_v32 }
0x1ae1   :  { %v3132_v61 = vpop.f32.mrf.mxu1 }
0x1ae2   :  { %v2482_v5 = vadd.f32 %v3132_v61, %v2403_v60 }
0x1ae3   :  { %v2476_v2 = vpop.f32.mrf.mxu1 }
0x1ae4   :  { %v2477_v62 = vadd.f32 %v2476_v2, %v2403_v60  ;;  %v2486_v0 = vmax.f32 %v2482_v5, 0.0 }
0x1ae6   :  { %v2485_v63 = vmax.f32 %v2477_v62, 0.0 }
0x1ae8   :  { %3149 = vmatprep.mubr.msk.f32.mxu0 %vm1210_vm4, %v2485_v63 }
0x1ae9   :  { %3150 = vmatmul.mubr.msk.f32.vlgmr.msra.gmra.mxu0 %vm1210_vm4, %v2486_v0 }
0x1ba9   :  { %v3151_v1 = vpop.f32.mrf.mxu0 }
0x1baa   :  { %v2569_v3 = vadd.f32 %v3151_v1, %v2490_v8 }
0x1bab   :  { %v2563_v4 = vpop.f32.mrf.mxu0 }
0x1bac   :  { %v2564_v46 = vadd.f32 %v2563_v4, %v2490_v8  ;;  %v2573_v6 = vadd.f32 %v2569_v3, %v2399_v57 }
0x1bae   :  { %v2572_v36 = vadd.f32 %v2564_v46, %v2398_v55  ;;  %v2577_v10 = vsel %vm76_vm0, %v2573_v6, 0.0 }
0x1baf   :  { %2578 = vadd.xlane.f32.xlu0 %v2577_v10 }
0x1bb0   :  { %v2574_v45 = vsel %vm76_vm0, %v2572_v36, 0.0 }
0x1bb1   :  { %2575 = vadd.xlane.f32.xlu1 %v2574_v45 }
0x1c38   :  { %v2579_v11 = vpop.xlane.xlu0 %2578 }
0x1c39   :  { %v2581_v13 = vmul.f32 0.03125, %v2579_v11 }
0x1c3a   :  { %v2576_v16 = vpop.xlane.xlu1 %2575 }
0x1c3b   :  { %v2583_v35 = vsub.f32 %v2573_v6, %v2581_v13  ;;  %v2580_v23 = vmul.f32 0.03125, %v2576_v16 }
0x1c3d   :  { %v2582_v24 = vsub.f32 %v2572_v36, %v2580_v23  ;;  %v2585_v25 = vmul.f32 %v2583_v35, %v2583_v35 }
0x1c3f   :  { %v2589_v44 = vsel %vm76_vm0, %v2585_v25, 0.0  ;;  %v2584_v26 = vmul.f32 %v2582_v24, %v2582_v24 }
0x1c40   :  { %2590 = vadd.xlane.f32.xlu0 %v2589_v44 }
0x1c41   :  { %v2586_v27 = vsel %vm76_vm0, %v2584_v26, 0.0 }
0x1c42   :  { %2587 = vadd.xlane.f32.xlu1 %v2586_v27 }
0x1cc9   :  { %v2591_v9 = vpop.xlane.xlu0 %2590 }
0x1cca   :  { %v2593_v29 = vmul.f32 0.03125, %v2591_v9 }
0x1ccb   :  { %v2588_v28 = vpop.xlane.xlu1 %2587 }
0x1ccc   :  { %v2595_v37 = vadd.f32 1e-05, %v2593_v29  ;;  %v2592_v38 = vmul.f32 0.03125, %v2588_v28 }
0x1cce   :  { %3256 = vrsqrt.f32 %v2595_v37  ;;  %v2594_v39 = vadd.f32 1e-05, %v2592_v38 }
0x1cd0   :  { %3258 = vrsqrt.f32 %v2594_v39 }
0x1cdb   :  { %v3257_v40 = vpop.eup %3256 }
0x1cdc   :  { %v2599_v42 = vmul.f32 %v3257_v40, %v2583_v35 }
0x1cdd   :  { %v3259_v43 = vpop.eup %3258 }
0x1cde   :  { %v2598_v33 = vmul.f32 %v3259_v43, %v2582_v24  ;;  %v2605_v18 = vmul.f32 %v2603_v41, %v2599_v42 }
0x1ce0   :  { %v2604_v47 = vmul.f32 %v2603_v41, %v2598_v33  ;;  %v2611_v51 = vadd.f32 %v2609_v49, %v2605_v18 }
0x1ce2   :  { %v2610_v48 = vadd.f32 %v2609_v49, %v2604_v47 }
0x1ce4   :  { %3160 = vmatprep.mubr.msk.f32.mxu1 %vm76_vm0, %v2610_v48 }
0x1ce5   :  { %3161 = vmatmul.mubr.msk.f32.vlgmr.msra.gmra.mxu1 %vm76_vm0, %v2611_v51 }
0x1da5   :  { %v3162_v12 = vpop.f32.mrf.mxu1 }
0x1da6   :  { %v2701_v53 = vadd.f32 %v3162_v12, %v2807_v52 }
0x1da7   :  { %v2695_v54 = vpop.f32.mrf.mxu1 }
0x1da8   :  { %2705 = vst.msk [vmem:[#allocation5 + $0x8] sm:$0xff] %vm166_vm1, %v2701_v53  ;;  %v2696_v7 = vadd.f32 %v2807_v52, %v2695_v54 }
0x1daa   :  { %2704 = vst.msk [vmem:[#allocation5] sm:$0xff] %vm166_vm1, %v2696_v7 }
0x1dab   :  { %3293 = shalt.err (!%p3290_p9)
}
0x1dac   :  { %2717 = dma.vmem_to_hbm [thread:$0]  %s2712_s26, 256, %s3933_s9, [#allocation4], %s3307_s12, %s3307_s12, %s3308_s13  }
0x1dad   :  { %3304 = dma.done.wait [#allocation4], 256  }
0x1dae   :  { %3305 = vsyncadd [#allocation4], 4294967040 }
0x1daf   :  { %2721 = vsyncpa [#allocation3], 1 }
0x1db0   :  { %2722 = vsyncpa [#allocation4], 1 }

</bundles_post_ra>
